<compile_context>
chip_gen: v7x
topology: tpu7x:2x2x1
jax: 0.10.0
libtpu: 0.0.40
codegen_flags: <defaults>
</compile_context>

<pallas_src>
import functools

import jax
import jax.numpy as jnp
import numpy as np
from jax import lax
from jax.experimental import pallas as pl
from jax.experimental.pallas import tpu as pltpu


# ----------------------------------------------------------------------------
# Kernel 1: hoisted input projection (one big matmul per direction).
# ----------------------------------------------------------------------------
def _input_proj_kernel(x_ref, wih_ref, b_ref, gx_ref):
    # x_ref: (S*B, I); wih_ref: (1, I, 4H); b_ref: (1, 1, 4H); gx_ref: (1, S*B, 4H)
    gx_ref[0] = (jnp.dot(x_ref[...], wih_ref[0],
                         preferred_element_type=jnp.float32)
                 + b_ref[0])


def input_projection_pallas(x2d, w_ihT, b):
    """x2d: (S*B, I); w_ihT: (D, I, 4H); b: (D, 1, 4H) -> (D, S*B, 4H)."""
    # TODO(synk): tile the (S*B) dimension for production-scale sequences;
    # a single block per direction is fine at these shapes.
    D, I, G = w_ihT.shape
    M = x2d.shape[0]
    return pl.pallas_call(
        _input_proj_kernel,
        out_shape=jax.ShapeDtypeStruct((D, M, G), jnp.float32),
        grid_spec=pltpu.PrefetchScalarGridSpec(
            num_scalar_prefetch=0,
            grid=(D,),
            in_specs=[
                pl.BlockSpec((M, I), lambda d: (0, 0)),        # shared activations
                pl.BlockSpec((1, I, G), lambda d: (d, 0, 0)),  # per-dir W_ih^T
                pl.BlockSpec((1, 1, G), lambda d: (d, 0, 0)),  # fused bias
            ],
            out_specs=pl.BlockSpec((1, M, G), lambda d: (d, 0, 0)),
        ),
        compiler_params=pltpu.CompilerParams(
            dimension_semantics=("parallel",)),
    )(x2d, w_ihT, b)


# ----------------------------------------------------------------------------
# Kernel 2: fused bidirectional recurrence.
#   grid = (num_dirs, num_time_chunks)
#   direction axis: "parallel"   (independent; shardable across TCs on v7x)
#   time-chunk axis: "arbitrary" (sequential recurrence, carries in VMEM)
# ----------------------------------------------------------------------------
def _lstm_recurrent_kernel(gx_ref, whh_ref, out_ref, h_out_ref, c_out_ref,
                           h_sc, c_sc):
    d = pl.program_id(0)              # direction
    c = pl.program_id(1)              # time chunk (sequential)
    T = gx_ref.shape[1]               # timesteps per chunk (static)
    H = h_sc.shape[-1]

    @pl.when(c == 0)
    def _init():
        h_sc[...] = jnp.zeros_like(h_sc)
        c_sc[...] = jnp.zeros_like(c_sc)

    whh = whh_ref[0]                  # (H, 4H), VMEM-resident across chunks

    def step(i, carry):
        # Forward direction walks i = 0..T-1; backward direction walks T-1-i
        # (its chunks are already fetched in reversed block order, see index_map).
        ti = d * (T - 1) + (1 - 2 * d) * i
        gates = gx_ref[0, ti] + jnp.dot(h_sc[...], whh,
                                        preferred_element_type=jnp.float32)
        # Gate math kept in f32 (v5e has no bf16 VPU/EUP path).
        i_g = jax.nn.sigmoid(gates[:, 0 * H:1 * H])
        f_g = jax.nn.sigmoid(gates[:, 1 * H:2 * H])
        g_g = jnp.tanh(gates[:, 2 * H:3 * H])
        o_g = jax.nn.sigmoid(gates[:, 3 * H:4 * H])
        c_new = f_g * c_sc[...] + i_g * g_g
        h_new = o_g * jnp.tanh(c_new)
        h_sc[...] = h_new
        c_sc[...] = c_new
        out_ref[0, ti] = h_new
        return carry

    lax.fori_loop(0, T, step, 0, unroll=True)

    # Defensive accumulator pattern: mirror the carries into the final-state
    # outputs every chunk (blocks are VMEM-resident across the time axis, so
    # this is a cheap store); the last write before writeback is the true
    # final state for this direction.
    h_out_ref[0] = h_sc[...]
    c_out_ref[0] = c_sc[...]


def lstm_recurrent_pallas(gx, w_hhT, time_chunk):
    """gx: (D, S, B, 4H) precomputed input gates; w_hhT: (D, H, 4H)."""
    D, S, B, G = gx.shape
    H = w_hhT.shape[1]
    T = time_chunk
    C = S // T
    assert C * T == S, "time_chunk must divide the sequence length"

    # Block index along time: chunk c for forward, C-1-c for backward.
    def rev(d, c):
        return d * (C - 1) + (1 - 2 * d) * c

    out, h_n, c_n = pl.pallas_call(
        _lstm_recurrent_kernel,
        out_shape=(
            jax.ShapeDtypeStruct((D, S, B, H), jnp.float32),
            jax.ShapeDtypeStruct((D, B, H), jnp.float32),
            jax.ShapeDtypeStruct((D, B, H), jnp.float32),
        ),
        grid_spec=pltpu.PrefetchScalarGridSpec(
            num_scalar_prefetch=0,
            grid=(D, C),
            in_specs=[
                # per-direction, per-chunk precomputed input gates
                pl.BlockSpec((1, T, B, G), lambda d, c: (d, rev(d, c), 0, 0)),
                # recurrent weights: constant index_map -> VMEM-resident.
                # (pl.Buffered(1) would single-buffer them; at H=32 the double
                #  buffer is only 16 KiB so we keep the default.)
                pl.BlockSpec((1, H, G), lambda d, c: (d, 0, 0)),
            ],
            out_specs=[
                pl.BlockSpec((1, T, B, H), lambda d, c: (d, rev(d, c), 0, 0)),
                pl.BlockSpec((1, B, H), lambda d, c: (d, 0, 0)),   # final h
                pl.BlockSpec((1, B, H), lambda d, c: (d, 0, 0)),   # final c
            ],
            scratch_shapes=[
                pltpu.VMEM((B, H), jnp.float32),   # h carry
                pltpu.VMEM((B, H), jnp.float32),   # c carry
            ],
        ),
        compiler_params=pltpu.CompilerParams(
            dimension_semantics=("parallel", "arbitrary")),
    )(gx, w_hhT)
    return out, h_n, c_n


# ----------------------------------------------------------------------------
# Encoder (embedding + multi-layer bidirectional LSTM) forward pass.
# ----------------------------------------------------------------------------
def _pick_time_chunk(S, max_chunk=16):
    """Largest divisor of S not exceeding max_chunk."""
    for t in range(min(S, max_chunk), 0, -1):
        if S % t == 0:
            return t
    return 1


def encoder_forward(src, params, num_layers, num_dirs, max_time_chunk=16):
    S, B = src.shape
    # Embedding lookup (gather stays in plain JAX).
    x = jnp.take(params["embedding"], src, axis=0)             # (S, B, E)
    # Embedding dropout -> identity (eval mode).
    T = _pick_time_chunk(S, max_time_chunk)
    h_list, c_list = [], []
    for layer in range(num_layers):
        w_ihT, w_hhT, b = params["layers"][layer]
        in_feat = x.shape[-1]
        # Hoisted input projection: one MXU matmul over all S*B rows per dir.
        gx = input_projection_pallas(x.reshape(S * B, in_feat), w_ihT, b)
        gx = gx.reshape(num_dirs, S, B, -1)                    # (D, S, B, 4H)
        out, h_n, c_n = lstm_recurrent_pallas(gx, w_hhT, T)
        h_list.append(h_n)
        c_list.append(c_n)
        # (S, B, D*H): concatenate directions along features (PyTorch layout).
        x = jnp.concatenate([out[dd] for dd in range(num_dirs)], axis=-1)
        # Inter-layer dropout -> identity (eval mode).
    hidden = jnp.concatenate(h_list, axis=0)                   # (L*D, B, H)
    cell = jnp.concatenate(c_list, axis=0)                     # (L*D, B, H)
    return x, (hidden, cell)


# ----------------------------------------------------------------------------
# Pure-JAX reference (lax.scan) for correctness checking.
# ----------------------------------------------------------------------------
def _lstm_layer_ref(x, w_ihT, w_hhT, b):
    S, B, _ = x.shape
    H = w_hhT.shape[0]

    def step(carry, xt):
        h, c = carry
        gates = xt @ w_ihT + h @ w_hhT + b
        i_g = jax.nn.sigmoid(gates[:, :H])
        f_g = jax.nn.sigmoid(gates[:, H:2 * H])
        g_g = jnp.tanh(gates[:, 2 * H:3 * H])
        o_g = jax.nn.sigmoid(gates[:, 3 * H:])
        c = f_g * c + i_g * g_g
        h = o_g * jnp.tanh(c)
        return (h, c), h

    (h, c), out = lax.scan(step, (jnp.zeros((B, H), jnp.float32),
                                  jnp.zeros((B, H), jnp.float32)), x)
    return out, h, c


def encoder_forward_ref(src, params, num_layers, num_dirs):
    x = jnp.take(params["embedding"], src, axis=0)
    h_list, c_list = [], []
    for layer in range(num_layers):
        w_ihT, w_hhT, b = params["layers"][layer]
        dir_outs = []
        for d in range(num_dirs):
            x_in = x if d == 0 else x[::-1]
            out, h_n, c_n = _lstm_layer_ref(x_in, w_ihT[d], w_hhT[d], b[d])
            if d == 1:
                out = out[::-1]
            dir_outs.append(out)
            h_list.append(h_n)
            c_list.append(c_n)
        x = dir_outs[0] if num_dirs == 1 else jnp.concatenate(dir_outs, axis=-1)
    return x, (jnp.stack(h_list, 0), jnp.stack(c_list, 0))


# ----------------------------------------------------------------------------
# Deterministic parameter init (PyTorch-like: U(-1/sqrt(H), 1/sqrt(H))).
# Weights stored stacked per direction, transposed, with fused bias.
# ----------------------------------------------------------------------------
def init_params(key, vocab, embed, hidden, num_layers, num_dirs):
    k_emb, key = jax.random.split(key)
    params = {
        "embedding": jax.random.normal(k_emb, (vocab, embed), jnp.float32),
        "layers": [],
    }
    bound = 1.0 / np.sqrt(hidden)
    for layer in range(num_layers):
        in_size = embed if layer == 0 else hidden * num_dirs
        w_ihT_l, w_hhT_l, b_l = [], [], []
        for _d in range(num_dirs):
            key, k1, k2, k3, k4 = jax.random.split(key, 5)
            w_ih = jax.random.uniform(k1, (4 * hidden, in_size), jnp.float32,
                                      -bound, bound)
            w_hh = jax.random.uniform(k2, (4 * hidden, hidden), jnp.float32,
                                      -bound, bound)
            b_ih = jax.random.uniform(k3, (4 * hidden,), jnp.float32, -bound, bound)
            b_hh = jax.random.uniform(k4, (4 * hidden,), jnp.float32, -bound, bound)
            w_ihT_l.append(w_ih.T)
            w_hhT_l.append(w_hh.T)
            b_l.append((b_ih + b_hh).reshape(1, 4 * hidden))
        params["layers"].append((jnp.stack(w_ihT_l, 0),     # (D, I, 4H)
                                 jnp.stack(w_hhT_l, 0),     # (D, H, 4H)
                                 jnp.stack(b_l, 0)))        # (D, 1, 4H)
    return params


if __name__ == "__main__":
    # Small config consistent with the module's constructor.
    VOCAB = 50          # input_dim
    HIDDEN = 32         # hidden_dim
    EMBED = 16          # embedding_size
    NUM_LAYERS = 2
    BIDIRECTIONAL = True
    NUM_DIRS = 2 if BIDIRECTIONAL else 1
    SEQ = 8
    BATCH = 2

    key = jax.random.PRNGKey(0)
    k_src, k_params = jax.random.split(key)
    src = jax.random.randint(k_src, (SEQ, BATCH), 0, VOCAB, dtype=jnp.int32)
    params = init_params(k_params, VOCAB, EMBED, HIDDEN, NUM_LAYERS, NUM_DIRS)

    fwd = jax.jit(functools.partial(encoder_forward, num_layers=NUM_LAYERS,
                                    num_dirs=NUM_DIRS))
    output, (hidden, cell) = jax.block_until_ready(fwd(src, params))

    # Sanity checks against pure-JAX reference.
    out_ref, (h_ref, c_ref) = encoder_forward_ref(src, params, NUM_LAYERS, NUM_DIRS)
    assert output.shape == (SEQ, BATCH, NUM_DIRS * HIDDEN)
    assert hidden.shape == (NUM_LAYERS * NUM_DIRS, BATCH, HIDDEN)
    assert cell.shape == (NUM_LAYERS * NUM_DIRS, BATCH, HIDDEN)
    np.testing.assert_allclose(np.asarray(output), np.asarray(out_ref),
                               rtol=1e-4, atol=1e-4)
    np.testing.assert_allclose(np.asarray(hidden), np.asarray(h_ref),
                               rtol=1e-4, atol=1e-4)
    np.testing.assert_allclose(np.asarray(cell), np.asarray(c_ref),
                               rtol=1e-4, atol=1e-4)

    print("KERNEL_OK")
</pallas_src>

<mosaic_0001>
module attributes {stable_mosaic.version = 11 : i64} {
  func.func @_input_proj_kernel(%arg0: i32, %arg1: memref<16x16xf32, #tpu.memory_space<vmem>>, %arg2: memref<1x16x128xf32, #tpu.memory_space<vmem>>, %arg3: memref<1x1x128xf32, #tpu.memory_space<vmem>>, %arg4: memref<1x16x128xf32, #tpu.memory_space<vmem>>) attributes {dimension_semantics = [#tpu.dimension_semantics<parallel>], iteration_bounds = array<i64: 2>, scalar_prefetch = 0 : i64, scratch_operands = 0 : i64, tpu.core_type = #tpu.core_type<tc>, window_params = [{pipeline_mode = #tpu.pipeline_mode<synchronous>, transform_indices = @transform_0, window_bounds = array<i64: 16, 16>}, {transform_indices = @transform_1, window_bounds = array<i64: 1, 16, 128>}, {transform_indices = @transform_2, window_bounds = array<i64: 1, 1, 128>}, {transform_indices = @transform_3, window_bounds = array<i64: 1, 16, 128>}]} {
    %c0 = arith.constant 0 : index
    %c0_0 = arith.constant 0 : index
    %0 = vector.load %arg1[%c0, %c0_0] : memref<16x16xf32, #tpu.memory_space<vmem>>, vector<16x16xf32>
    %c0_1 = arith.constant 0 : index
    %c0_2 = arith.constant 0 : index
    %c0_3 = arith.constant 0 : index
    %1 = vector.load %arg2[%c0_1, %c0_2, %c0_3] : memref<1x16x128xf32, #tpu.memory_space<vmem>>, vector<1x16x128xf32>
    %2 = vector.shape_cast %1 : vector<1x16x128xf32> to vector<16x128xf32>
    %cst = arith.constant dense<0.000000e+00> : vector<16x128xf32>
    %3 = tpu.matmul %0, %2, %cst {dimension_numbers = #tpu.dot_dimension_numbers<[1], [0], [0], [1], [0, 0, 1, 1], [], []>} : vector<16x16xf32>, vector<16x128xf32>, vector<16x128xf32> -> vector<16x128xf32>
    %c0_4 = arith.constant 0 : index
    %c0_5 = arith.constant 0 : index
    %c0_6 = arith.constant 0 : index
    %4 = vector.load %arg3[%c0_4, %c0_5, %c0_6] : memref<1x1x128xf32, #tpu.memory_space<vmem>>, vector<1x1x128xf32>
    %5 = vector.shape_cast %4 : vector<1x1x128xf32> to vector<1x128xf32>
    %6 = vector.broadcast %5 : vector<1x128xf32> to vector<16x128xf32>
    %7 = arith.addf %3, %6 : vector<16x128xf32>
    %c0_7 = arith.constant 0 : index
    %c0_8 = arith.constant 0 : index
    %c0_9 = arith.constant 0 : index
    %8 = vector.load %arg4[%c0_7, %c0_8, %c0_9] : memref<1x16x128xf32, #tpu.memory_space<vmem>>, vector<1x16x128xf32>
    %9 = vector.shape_cast %8 : vector<1x16x128xf32> to vector<16x128xf32>
    %10 = vector.shape_cast %7 : vector<16x128xf32> to vector<1x16x128xf32>
    tpu.vector_store %arg4[%c0_7, %c0_8, %c0_9], %10 {strides = array<i32>} : memref<1x16x128xf32, #tpu.memory_space<vmem>>, vector<1x16x128xf32>,
    return
  }
  func.func @transform_0(%arg0: i32) -> (i32, i32) {
    %c0_i32 = arith.constant 0 : i32
    %c0_i32_0 = arith.constant 0 : i32
    %c0_i32_1 = arith.constant 0 : i32
    return %c0_i32, %c0_i32_0 : i32, i32
  }
  func.func @transform_1(%arg0: i32) -> (i32, i32, i32) {
    %c0_i32 = arith.constant 0 : i32
    %c0_i32_0 = arith.constant 0 : i32
    %c0_i32_1 = arith.constant 0 : i32
    return %arg0, %c0_i32, %c0_i32_0 : i32, i32, i32
  }
  func.func @transform_2(%arg0: i32) -> (i32, i32, i32) {
    %c0_i32 = arith.constant 0 : i32
    %c0_i32_0 = arith.constant 0 : i32
    %c0_i32_1 = arith.constant 0 : i32
    return %arg0, %c0_i32, %c0_i32_0 : i32, i32, i32
  }
  func.func @transform_3(%arg0: i32) -> (i32, i32, i32) {
    %c0_i32 = arith.constant 0 : i32
    %c0_i32_0 = arith.constant 0 : i32
    %c0_i32_1 = arith.constant 0 : i32
    return %arg0, %c0_i32, %c0_i32_0 : i32, i32, i32
  }
}

module attributes {stable_mosaic.version = 11 : i64} {
  func.func @_input_proj_kernel(%arg0: i32, %arg1: memref<16x64xf32, #tpu.memory_space<vmem>>, %arg2: memref<1x64x128xf32, #tpu.memory_space<vmem>>, %arg3: memref<1x1x128xf32, #tpu.memory_space<vmem>>, %arg4: memref<1x16x128xf32, #tpu.memory_space<vmem>>) attributes {dimension_semantics = [#tpu.dimension_semantics<parallel>], iteration_bounds = array<i64: 2>, scalar_prefetch = 0 : i64, scratch_operands = 0 : i64, tpu.core_type = #tpu.core_type<tc>, window_params = [{pipeline_mode = #tpu.pipeline_mode<synchronous>, transform_indices = @transform_0, window_bounds = array<i64: 16, 64>}, {transform_indices = @transform_1, window_bounds = array<i64: 1, 64, 128>}, {transform_indices = @transform_2, window_bounds = array<i64: 1, 1, 128>}, {transform_indices = @transform_3, window_bounds = array<i64: 1, 16, 128>}]} {
    %c0 = arith.constant 0 : index
    %c0_0 = arith.constant 0 : index
    %0 = vector.load %arg1[%c0, %c0_0] : memref<16x64xf32, #tpu.memory_space<vmem>>, vector<16x64xf32>
    %c0_1 = arith.constant 0 : index
    %c0_2 = arith.constant 0 : index
    %c0_3 = arith.constant 0 : index
    %1 = vector.load %arg2[%c0_1, %c0_2, %c0_3] : memref<1x64x128xf32, #tpu.memory_space<vmem>>, vector<1x64x128xf32>
    %2 = vector.shape_cast %1 : vector<1x64x128xf32> to vector<64x128xf32>
    %cst = arith.constant dense<0.000000e+00> : vector<16x128xf32>
    %3 = tpu.matmul %0, %2, %cst {dimension_numbers = #tpu.dot_dimension_numbers<[1], [0], [0], [1], [0, 0, 1, 1], [], []>} : vector<16x64xf32>, vector<64x128xf32>, vector<16x128xf32> -> vector<16x128xf32>
    %c0_4 = arith.constant 0 : index
    %c0_5 = arith.constant 0 : index
    %c0_6 = arith.constant 0 : index
    %4 = vector.load %arg3[%c0_4, %c0_5, %c0_6] : memref<1x1x128xf32, #tpu.memory_space<vmem>>, vector<1x1x128xf32>
    %5 = vector.shape_cast %4 : vector<1x1x128xf32> to vector<1x128xf32>
    %6 = vector.broadcast %5 : vector<1x128xf32> to vector<16x128xf32>
    %7 = arith.addf %3, %6 : vector<16x128xf32>
    %c0_7 = arith.constant 0 : index
    %c0_8 = arith.constant 0 : index
    %c0_9 = arith.constant 0 : index
    %8 = vector.load %arg4[%c0_7, %c0_8, %c0_9] : memref<1x16x128xf32, #tpu.memory_space<vmem>>, vector<1x16x128xf32>
    %9 = vector.shape_cast %8 : vector<1x16x128xf32> to vector<16x128xf32>
    %10 = vector.shape_cast %7 : vector<16x128xf32> to vector<1x16x128xf32>
    tpu.vector_store %arg4[%c0_7, %c0_8, %c0_9], %10 {strides = array<i32>} : memref<1x16x128xf32, #tpu.memory_space<vmem>>, vector<1x16x128xf32>,
    return
  }
  func.func @transform_0(%arg0: i32) -> (i32, i32) {
    %c0_i32 = arith.constant 0 : i32
    %c0_i32_0 = arith.constant 0 : i32
    %c0_i32_1 = arith.constant 0 : i32
    return %c0_i32, %c0_i32_0 : i32, i32
  }
  func.func @transform_1(%arg0: i32) -> (i32, i32, i32) {
    %c0_i32 = arith.constant 0 : i32
    %c0_i32_0 = arith.constant 0 : i32
    %c0_i32_1 = arith.constant 0 : i32
    return %arg0, %c0_i32, %c0_i32_0 : i32, i32, i32
  }
  func.func @transform_2(%arg0: i32) -> (i32, i32, i32) {
    %c0_i32 = arith.constant 0 : i32
    %c0_i32_0 = arith.constant 0 : i32
    %c0_i32_1 = arith.constant 0 : i32
    return %arg0, %c0_i32, %c0_i32_0 : i32, i32, i32
  }
  func.func @transform_3(%arg0: i32) -> (i32, i32, i32) {
    %c0_i32 = arith.constant 0 : i32
    %c0_i32_0 = arith.constant 0 : i32
    %c0_i32_1 = arith.constant 0 : i32
    return %arg0, %c0_i32, %c0_i32_0 : i32, i32, i32
  }
}

module attributes {stable_mosaic.version = 11 : i64} {
  func.func @_lstm_recurrent_kernel(%arg0: i32, %arg1: i32, %arg2: memref<1x8x2x128xf32, #tpu.memory_space<vmem>>, %arg3: memref<1x32x128xf32, #tpu.memory_space<vmem>>, %arg4: memref<1x8x2x32xf32, #tpu.memory_space<vmem>>, %arg5: memref<1x2x32xf32, #tpu.memory_space<vmem>>, %arg6: memref<1x2x32xf32, #tpu.memory_space<vmem>>, %arg7: memref<2x32xf32, #tpu.memory_space<vmem>>, %arg8: memref<2x32xf32, #tpu.memory_space<vmem>>) attributes {dimension_semantics = [#tpu.dimension_semantics<parallel>, #tpu.dimension_semantics<arbitrary>], iteration_bounds = array<i64: 2, 1>, scalar_prefetch = 0 : i64, scratch_operands = 2 : i64, tpu.core_type = #tpu.core_type<tc>, window_params = [{transform_indices = @transform_0, window_bounds = array<i64: 1, 8, 2, 128>}, {transform_indices = @transform_1, window_bounds = array<i64: 1, 32, 128>}, {transform_indices = @transform_2, window_bounds = array<i64: 1, 8, 2, 32>}, {transform_indices = @transform_3, window_bounds = array<i64: 1, 2, 32>}, {transform_indices = @transform_4, window_bounds = array<i64: 1, 2, 32>}]} {
    %c0_i32 = arith.constant 0 : i32
    %0 = arith.cmpi eq, %arg1, %c0_i32 : i32
    %1 = arith.extui %0 : i1 to i32
    %c0_i32_0 = arith.constant 0 : i32
    %2 = arith.cmpi ne, %1, %c0_i32_0 : i32
    scf.if %2 {
      %cst_181 = arith.constant 0.000000e+00 : f32
      %357 = vector.broadcast %cst_181 : f32 to vector<2x32xf32>
      %c0_182 = arith.constant 0 : index
      %c0_183 = arith.constant 0 : index
      %358 = vector.load %arg7[%c0_182, %c0_183] : memref<2x32xf32, #tpu.memory_space<vmem>>, vector<2x32xf32>
      tpu.vector_store %arg7[%c0_182, %c0_183], %357 {strides = array<i32>} : memref<2x32xf32, #tpu.memory_space<vmem>>, vector<2x32xf32>,
      %cst_184 = arith.constant 0.000000e+00 : f32
      %359 = vector.broadcast %cst_184 : f32 to vector<2x32xf32>
      %c0_185 = arith.constant 0 : index
      %c0_186 = arith.constant 0 : index
      %360 = vector.load %arg8[%c0_185, %c0_186] : memref<2x32xf32, #tpu.memory_space<vmem>>, vector<2x32xf32>
      tpu.vector_store %arg8[%c0_185, %c0_186], %359 {strides = array<i32>} : memref<2x32xf32, #tpu.memory_space<vmem>>, vector<2x32xf32>,
    } else {
    }
    %c0 = arith.constant 0 : index
    %c0_1 = arith.constant 0 : index
    %c0_2 = arith.constant 0 : index
    %3 = vector.load %arg3[%c0, %c0_1, %c0_2] : memref<1x32x128xf32, #tpu.memory_space<vmem>>, vector<1x32x128xf32>
    %4 = vector.shape_cast %3 : vector<1x32x128xf32> to vector<32x128xf32>
    %c0_i32_3 = arith.constant 0 : i32
    %c7_i32 = arith.constant 7 : i32
    %5 = arith.muli %arg0, %c7_i32 : i32
    %c2_i32 = arith.constant 2 : i32
    %6 = arith.muli %c2_i32, %arg0 : i32
    %c1_i32 = arith.constant 1 : i32
    %7 = arith.subi %c1_i32, %6 : i32
    %8 = arith.muli %7, %c0_i32_3 : i32
    %9 = arith.addi %5, %8 : i32
    %c0_4 = arith.constant 0 : index
    %10 = arith.index_cast %9 : i32 to index
    %c0_5 = arith.constant 0 : index
    %c0_6 = arith.constant 0 : index
    %11 = vector.load %arg2[%c0_4, %10, %c0_5, %c0_6] : memref<1x8x2x128xf32, #tpu.memory_space<vmem>>, vector<1x1x2x128xf32>
    %12 = vector.shape_cast %11 : vector<1x1x2x128xf32> to vector<2x128xf32>
    %c0_7 = arith.constant 0 : index
    %c0_8 = arith.constant 0 : index
    %13 = vector.load %arg7[%c0_7, %c0_8] : memref<2x32xf32, #tpu.memory_space<vmem>>, vector<2x32xf32>
    %cst = arith.constant dense<0.000000e+00> : vector<2x128xf32>
    %14 = tpu.matmul %13, %4, %cst {dimension_numbers = #tpu.dot_dimension_numbers<[1], [0], [0], [1], [0, 0, 1, 1], [], []>} : vector<2x32xf32>, vector<32x128xf32>, vector<2x128xf32> -> vector<2x128xf32>
    %15 = arith.addf %12, %14 : vector<2x128xf32>
    %16 = vector.extract_strided_slice %15 {offsets = [0, 0], sizes = [2, 32], strides = [1, 1]} : vector<2x128xf32> to vector<2x32xf32>
    %17 = arith.negf %16 : vector<2x32xf32>
    %18 = math.exp %17 : vector<2x32xf32>
    %cst_9 = arith.constant 1.000000e+00 : f32
    %19 = vector.broadcast %cst_9 : f32 to vector<2x32xf32>
    %20 = arith.addf %19, %18 : vector<2x32xf32>
    %21 = arith.divf %19, %20 : vector<2x32xf32>
    %22 = vector.extract_strided_slice %15 {offsets = [0, 32], sizes = [2, 32], strides = [1, 1]} : vector<2x128xf32> to vector<2x32xf32>
    %23 = arith.negf %22 : vector<2x32xf32>
    %24 = math.exp %23 : vector<2x32xf32>
    %cst_10 = arith.constant 1.000000e+00 : f32
    %25 = vector.broadcast %cst_10 : f32 to vector<2x32xf32>
    %26 = arith.addf %25, %24 : vector<2x32xf32>
    %27 = arith.divf %25, %26 : vector<2x32xf32>
    %28 = vector.extract_strided_slice %15 {offsets = [0, 64], sizes = [2, 32], strides = [1, 1]} : vector<2x128xf32> to vector<2x32xf32>
    %29 = math.tanh %28 : vector<2x32xf32>
    %30 = vector.extract_strided_slice %15 {offsets = [0, 96], sizes = [2, 32], strides = [1, 1]} : vector<2x128xf32> to vector<2x32xf32>
    %31 = arith.negf %30 : vector<2x32xf32>
    %32 = math.exp %31 : vector<2x32xf32>
    %cst_11 = arith.constant 1.000000e+00 : f32
    %33 = vector.broadcast %cst_11 : f32 to vector<2x32xf32>
    %34 = arith.addf %33, %32 : vector<2x32xf32>
    %35 = arith.divf %33, %34 : vector<2x32xf32>
    %c0_12 = arith.constant 0 : index
    %c0_13 = arith.constant 0 : index
    %36 = vector.load %arg8[%c0_12, %c0_13] : memref<2x32xf32, #tpu.memory_space<vmem>>, vector<2x32xf32>
    %37 = arith.mulf %27, %36 : vector<2x32xf32>
    %38 = arith.mulf %21, %29 : vector<2x32xf32>
    %39 = arith.addf %37, %38 : vector<2x32xf32>
    %40 = math.tanh %39 : vector<2x32xf32>
    %41 = arith.mulf %35, %40 : vector<2x32xf32>
    %c0_14 = arith.constant 0 : index
    %c0_15 = arith.constant 0 : index
    %42 = vector.load %arg7[%c0_14, %c0_15] : memref<2x32xf32, #tpu.memory_space<vmem>>, vector<2x32xf32>
    tpu.vector_store %arg7[%c0_14, %c0_15], %41 {strides = array<i32>} : memref<2x32xf32, #tpu.memory_space<vmem>>, vector<2x32xf32>,
    %c0_16 = arith.constant 0 : index
    %c0_17 = arith.constant 0 : index
    %43 = vector.load %arg8[%c0_16, %c0_17] : memref<2x32xf32, #tpu.memory_space<vmem>>, vector<2x32xf32>
    tpu.vector_store %arg8[%c0_16, %c0_17], %39 {strides = array<i32>} : memref<2x32xf32, #tpu.memory_space<vmem>>, vector<2x32xf32>,
    %c0_18 = arith.constant 0 : index
    %44 = arith.index_cast %9 : i32 to index
    %c0_19 = arith.constant 0 : index
    %c0_20 = arith.constant 0 : index
    %45 = vector.load %arg4[%c0_18, %44, %c0_19, %c0_20] : memref<1x8x2x32xf32, #tpu.memory_space<vmem>>, vector<1x1x2x32xf32>
    %46 = vector.shape_cast %45 : vector<1x1x2x32xf32> to vector<2x32xf32>
    %47 = vector.shape_cast %41 : vector<2x32xf32> to vector<1x1x2x32xf32>
    tpu.vector_store %arg4[%c0_18, %44, %c0_19, %c0_20], %47 {strides = array<i32>} : memref<1x8x2x32xf32, #tpu.memory_space<vmem>>, vector<1x1x2x32xf32>,
    %c1_i32_21 = arith.constant 1 : i32
    %c7_i32_22 = arith.constant 7 : i32
    %48 = arith.muli %arg0, %c7_i32_22 : i32
    %c2_i32_23 = arith.constant 2 : i32
    %49 = arith.muli %c2_i32_23, %arg0 : i32
    %c1_i32_24 = arith.constant 1 : i32
    %50 = arith.subi %c1_i32_24, %49 : i32
    %51 = arith.muli %50, %c1_i32_21 : i32
    %52 = arith.addi %48, %51 : i32
    %c0_25 = arith.constant 0 : index
    %53 = arith.index_cast %52 : i32 to index
    %c0_26 = arith.constant 0 : index
    %c0_27 = arith.constant 0 : index
    %54 = vector.load %arg2[%c0_25, %53, %c0_26, %c0_27] : memref<1x8x2x128xf32, #tpu.memory_space<vmem>>, vector<1x1x2x128xf32>
    %55 = vector.shape_cast %54 : vector<1x1x2x128xf32> to vector<2x128xf32>
    %c0_28 = arith.constant 0 : index
    %c0_29 = arith.constant 0 : index
    %56 = vector.load %arg7[%c0_28, %c0_29] : memref<2x32xf32, #tpu.memory_space<vmem>>, vector<2x32xf32>
    %cst_30 = arith.constant dense<0.000000e+00> : vector<2x128xf32>
    %57 = tpu.matmul %56, %4, %cst_30 {dimension_numbers = #tpu.dot_dimension_numbers<[1], [0], [0], [1], [0, 0, 1, 1], [], []>} : vector<2x32xf32>, vector<32x128xf32>, vector<2x128xf32> -> vector<2x128xf32>
    %58 = arith.addf %55, %57 : vector<2x128xf32>
    %59 = vector.extract_strided_slice %58 {offsets = [0, 0], sizes = [2, 32], strides = [1, 1]} : vector<2x128xf32> to vector<2x32xf32>
    %60 = arith.negf %59 : vector<2x32xf32>
    %61 = math.exp %60 : vector<2x32xf32>
    %cst_31 = arith.constant 1.000000e+00 : f32
    %62 = vector.broadcast %cst_31 : f32 to vector<2x32xf32>
    %63 = arith.addf %62, %61 : vector<2x32xf32>
    %64 = arith.divf %62, %63 : vector<2x32xf32>
    %65 = vector.extract_strided_slice %58 {offsets = [0, 32], sizes = [2, 32], strides = [1, 1]} : vector<2x128xf32> to vector<2x32xf32>
    %66 = arith.negf %65 : vector<2x32xf32>
    %67 = math.exp %66 : vector<2x32xf32>
    %cst_32 = arith.constant 1.000000e+00 : f32
    %68 = vector.broadcast %cst_32 : f32 to vector<2x32xf32>
    %69 = arith.addf %68, %67 : vector<2x32xf32>
    %70 = arith.divf %68, %69 : vector<2x32xf32>
    %71 = vector.extract_strided_slice %58 {offsets = [0, 64], sizes = [2, 32], strides = [1, 1]} : vector<2x128xf32> to vector<2x32xf32>
    %72 = math.tanh %71 : vector<2x32xf32>
    %73 = vector.extract_strided_slice %58 {offsets = [0, 96], sizes = [2, 32], strides = [1, 1]} : vector<2x128xf32> to vector<2x32xf32>
    %74 = arith.negf %73 : vector<2x32xf32>
    %75 = math.exp %74 : vector<2x32xf32>
    %cst_33 = arith.constant 1.000000e+00 : f32
    %76 = vector.broadcast %cst_33 : f32 to vector<2x32xf32>
    %77 = arith.addf %76, %75 : vector<2x32xf32>
    %78 = arith.divf %76, %77 : vector<2x32xf32>
    %c0_34 = arith.constant 0 : index
    %c0_35 = arith.constant 0 : index
    %79 = vector.load %arg8[%c0_34, %c0_35] : memref<2x32xf32, #tpu.memory_space<vmem>>, vector<2x32xf32>
    %80 = arith.mulf %70, %79 : vector<2x32xf32>
    %81 = arith.mulf %64, %72 : vector<2x32xf32>
    %82 = arith.addf %80, %81 : vector<2x32xf32>
    %83 = math.tanh %82 : vector<2x32xf32>
    %84 = arith.mulf %78, %83 : vector<2x32xf32>
    %c0_36 = arith.constant 0 : index
    %c0_37 = arith.constant 0 : index
    %85 = vector.load %arg7[%c0_36, %c0_37] : memref<2x32xf32, #tpu.memory_space<vmem>>, vector<2x32xf32>
    tpu.vector_store %arg7[%c0_36, %c0_37], %84 {strides = array<i32>} : memref<2x32xf32, #tpu.memory_space<vmem>>, vector<2x32xf32>,
    %c0_38 = arith.constant 0 : index
    %c0_39 = arith.constant 0 : index
    %86 = vector.load %arg8[%c0_38, %c0_39] : memref<2x32xf32, #tpu.memory_space<vmem>>, vector<2x32xf32>
    tpu.vector_store %arg8[%c0_38, %c0_39], %82 {strides = array<i32>} : memref<2x32xf32, #tpu.memory_space<vmem>>, vector<2x32xf32>,
    %c0_40 = arith.constant 0 : index
    %87 = arith.index_cast %52 : i32 to index
    %c0_41 = arith.constant 0 : index
    %c0_42 = arith.constant 0 : index
    %88 = vector.load %arg4[%c0_40, %87, %c0_41, %c0_42] : memref<1x8x2x32xf32, #tpu.memory_space<vmem>>, vector<1x1x2x32xf32>
    %89 = vector.shape_cast %88 : vector<1x1x2x32xf32> to vector<2x32xf32>
    %90 = vector.shape_cast %84 : vector<2x32xf32> to vector<1x1x2x32xf32>
    tpu.vector_store %arg4[%c0_40, %87, %c0_41, %c0_42], %90 {strides = array<i32>} : memref<1x8x2x32xf32, #tpu.memory_space<vmem>>, vector<1x1x2x32xf32>,
    %c2_i32_43 = arith.constant 2 : i32
    %c7_i32_44 = arith.constant 7 : i32
    %91 = arith.muli %arg0, %c7_i32_44 : i32
    %c2_i32_45 = arith.constant 2 : i32
    %92 = arith.muli %c2_i32_45, %arg0 : i32
    %c1_i32_46 = arith.constant 1 : i32
    %93 = arith.subi %c1_i32_46, %92 : i32
    %94 = arith.muli %93, %c2_i32_43 : i32
    %95 = arith.addi %91, %94 : i32
    %c0_47 = arith.constant 0 : index
    %96 = arith.index_cast %95 : i32 to index
    %c0_48 = arith.constant 0 : index
    %c0_49 = arith.constant 0 : index
    %97 = vector.load %arg2[%c0_47, %96, %c0_48, %c0_49] : memref<1x8x2x128xf32, #tpu.memory_space<vmem>>, vector<1x1x2x128xf32>
    %98 = vector.shape_cast %97 : vector<1x1x2x128xf32> to vector<2x128xf32>
    %c0_50 = arith.constant 0 : index
    %c0_51 = arith.constant 0 : index
    %99 = vector.load %arg7[%c0_50, %c0_51] : memref<2x32xf32, #tpu.memory_space<vmem>>, vector<2x32xf32>
    %cst_52 = arith.constant dense<0.000000e+00> : vector<2x128xf32>
    %100 = tpu.matmul %99, %4, %cst_52 {dimension_numbers = #tpu.dot_dimension_numbers<[1], [0], [0], [1], [0, 0, 1, 1], [], []>} : vector<2x32xf32>, vector<32x128xf32>, vector<2x128xf32> -> vector<2x128xf32>
    %101 = arith.addf %98, %100 : vector<2x128xf32>
    %102 = vector.extract_strided_slice %101 {offsets = [0, 0], sizes = [2, 32], strides = [1, 1]} : vector<2x128xf32> to vector<2x32xf32>
    %103 = arith.negf %102 : vector<2x32xf32>
    %104 = math.exp %103 : vector<2x32xf32>
    %cst_53 = arith.constant 1.000000e+00 : f32
    %105 = vector.broadcast %cst_53 : f32 to vector<2x32xf32>
    %106 = arith.addf %105, %104 : vector<2x32xf32>
    %107 = arith.divf %105, %106 : vector<2x32xf32>
    %108 = vector.extract_strided_slice %101 {offsets = [0, 32], sizes = [2, 32], strides = [1, 1]} : vector<2x128xf32> to vector<2x32xf32>
    %109 = arith.negf %108 : vector<2x32xf32>
    %110 = math.exp %109 : vector<2x32xf32>
    %cst_54 = arith.constant 1.000000e+00 : f32
    %111 = vector.broadcast %cst_54 : f32 to vector<2x32xf32>
    %112 = arith.addf %111, %110 : vector<2x32xf32>
    %113 = arith.divf %111, %112 : vector<2x32xf32>
    %114 = vector.extract_strided_slice %101 {offsets = [0, 64], sizes = [2, 32], strides = [1, 1]} : vector<2x128xf32> to vector<2x32xf32>
    %115 = math.tanh %114 : vector<2x32xf32>
    %116 = vector.extract_strided_slice %101 {offsets = [0, 96], sizes = [2, 32], strides = [1, 1]} : vector<2x128xf32> to vector<2x32xf32>
    %117 = arith.negf %116 : vector<2x32xf32>
    %118 = math.exp %117 : vector<2x32xf32>
    %cst_55 = arith.constant 1.000000e+00 : f32
    %119 = vector.broadcast %cst_55 : f32 to vector<2x32xf32>
    %120 = arith.addf %119, %118 : vector<2x32xf32>
    %121 = arith.divf %119, %120 : vector<2x32xf32>
    %c0_56 = arith.constant 0 : index
    %c0_57 = arith.constant 0 : index
    %122 = vector.load %arg8[%c0_56, %c0_57] : memref<2x32xf32, #tpu.memory_space<vmem>>, vector<2x32xf32>
    %123 = arith.mulf %113, %122 : vector<2x32xf32>
    %124 = arith.mulf %107, %115 : vector<2x32xf32>
    %125 = arith.addf %123, %124 : vector<2x32xf32>
    %126 = math.tanh %125 : vector<2x32xf32>
    %127 = arith.mulf %121, %126 : vector<2x32xf32>
    %c0_58 = arith.constant 0 : index
    %c0_59 = arith.constant 0 : index
    %128 = vector.load %arg7[%c0_58, %c0_59] : memref<2x32xf32, #tpu.memory_space<vmem>>, vector<2x32xf32>
    tpu.vector_store %arg7[%c0_58, %c0_59], %127 {strides = array<i32>} : memref<2x32xf32, #tpu.memory_space<vmem>>, vector<2x32xf32>,
    %c0_60 = arith.constant 0 : index
    %c0_61 = arith.constant 0 : index
    %129 = vector.load %arg8[%c0_60, %c0_61] : memref<2x32xf32, #tpu.memory_space<vmem>>, vector<2x32xf32>
    tpu.vector_store %arg8[%c0_60, %c0_61], %125 {strides = array<i32>} : memref<2x32xf32, #tpu.memory_space<vmem>>, vector<2x32xf32>,
    %c0_62 = arith.constant 0 : index
    %130 = arith.index_cast %95 : i32 to index
    %c0_63 = arith.constant 0 : index
    %c0_64 = arith.constant 0 : index
    %131 = vector.load %arg4[%c0_62, %130, %c0_63, %c0_64] : memref<1x8x2x32xf32, #tpu.memory_space<vmem>>, vector<1x1x2x32xf32>
    %132 = vector.shape_cast %131 : vector<1x1x2x32xf32> to vector<2x32xf32>
    %133 = vector.shape_cast %127 : vector<2x32xf32> to vector<1x1x2x32xf32>
    tpu.vector_store %arg4[%c0_62, %130, %c0_63, %c0_64], %133 {strides = array<i32>} : memref<1x8x2x32xf32, #tpu.memory_space<vmem>>, vector<1x1x2x32xf32>,
    %c3_i32 = arith.constant 3 : i32
    %c7_i32_65 = arith.constant 7 : i32
    %134 = arith.muli %arg0, %c7_i32_65 : i32
    %c2_i32_66 = arith.constant 2 : i32
    %135 = arith.muli %c2_i32_66, %arg0 : i32
    %c1_i32_67 = arith.constant 1 : i32
    %136 = arith.subi %c1_i32_67, %135 : i32
    %137 = arith.muli %136, %c3_i32 : i32
    %138 = arith.addi %134, %137 : i32
    %c0_68 = arith.constant 0 : index
    %139 = arith.index_cast %138 : i32 to index
    %c0_69 = arith.constant 0 : index
    %c0_70 = arith.constant 0 : index
    %140 = vector.load %arg2[%c0_68, %139, %c0_69, %c0_70] : memref<1x8x2x128xf32, #tpu.memory_space<vmem>>, vector<1x1x2x128xf32>
    %141 = vector.shape_cast %140 : vector<1x1x2x128xf32> to vector<2x128xf32>
    %c0_71 = arith.constant 0 : index
    %c0_72 = arith.constant 0 : index
    %142 = vector.load %arg7[%c0_71, %c0_72] : memref<2x32xf32, #tpu.memory_space<vmem>>, vector<2x32xf32>
    %cst_73 = arith.constant dense<0.000000e+00> : vector<2x128xf32>
    %143 = tpu.matmul %142, %4, %cst_73 {dimension_numbers = #tpu.dot_dimension_numbers<[1], [0], [0], [1], [0, 0, 1, 1], [], []>} : vector<2x32xf32>, vector<32x128xf32>, vector<2x128xf32> -> vector<2x128xf32>
    %144 = arith.addf %141, %143 : vector<2x128xf32>
    %145 = vector.extract_strided_slice %144 {offsets = [0, 0], sizes = [2, 32], strides = [1, 1]} : vector<2x128xf32> to vector<2x32xf32>
    %146 = arith.negf %145 : vector<2x32xf32>
    %147 = math.exp %146 : vector<2x32xf32>
    %cst_74 = arith.constant 1.000000e+00 : f32
    %148 = vector.broadcast %cst_74 : f32 to vector<2x32xf32>
    %149 = arith.addf %148, %147 : vector<2x32xf32>
    %150 = arith.divf %148, %149 : vector<2x32xf32>
    %151 = vector.extract_strided_slice %144 {offsets = [0, 32], sizes = [2, 32], strides = [1, 1]} : vector<2x128xf32> to vector<2x32xf32>
    %152 = arith.negf %151 : vector<2x32xf32>
    %153 = math.exp %152 : vector<2x32xf32>
    %cst_75 = arith.constant 1.000000e+00 : f32
    %154 = vector.broadcast %cst_75 : f32 to vector<2x32xf32>
    %155 = arith.addf %154, %153 : vector<2x32xf32>
    %156 = arith.divf %154, %155 : vector<2x32xf32>
    %157 = vector.extract_strided_slice %144 {offsets = [0, 64], sizes = [2, 32], strides = [1, 1]} : vector<2x128xf32> to vector<2x32xf32>
    %158 = math.tanh %157 : vector<2x32xf32>
    %159 = vector.extract_strided_slice %144 {offsets = [0, 96], sizes = [2, 32], strides = [1, 1]} : vector<2x128xf32> to vector<2x32xf32>
    %160 = arith.negf %159 : vector<2x32xf32>
    %161 = math.exp %160 : vector<2x32xf32>
    %cst_76 = arith.constant 1.000000e+00 : f32
    %162 = vector.broadcast %cst_76 : f32 to vector<2x32xf32>
    %163 = arith.addf %162, %161 : vector<2x32xf32>
    %164 = arith.divf %162, %163 : vector<2x32xf32>
    %c0_77 = arith.constant 0 : index
    %c0_78 = arith.constant 0 : index
    %165 = vector.load %arg8[%c0_77, %c0_78] : memref<2x32xf32, #tpu.memory_space<vmem>>, vector<2x32xf32>
    %166 = arith.mulf %156, %165 : vector<2x32xf32>
    %167 = arith.mulf %150, %158 : vector<2x32xf32>
    %168 = arith.addf %166, %167 : vector<2x32xf32>
    %169 = math.tanh %168 : vector<2x32xf32>
    %170 = arith.mulf %164, %169 : vector<2x32xf32>
    %c0_79 = arith.constant 0 : index
    %c0_80 = arith.constant 0 : index
    %171 = vector.load %arg7[%c0_79, %c0_80] : memref<2x32xf32, #tpu.memory_space<vmem>>, vector<2x32xf32>
    tpu.vector_store %arg7[%c0_79, %c0_80], %170 {strides = array<i32>} : memref<2x32xf32, #tpu.memory_space<vmem>>, vector<2x32xf32>,
    %c0_81 = arith.constant 0 : index
    %c0_82 = arith.constant 0 : index
    %172 = vector.load %arg8[%c0_81, %c0_82] : memref<2x32xf32, #tpu.memory_space<vmem>>, vector<2x32xf32>
    tpu.vector_store %arg8[%c0_81, %c0_82], %168 {strides = array<i32>} : memref<2x32xf32, #tpu.memory_space<vmem>>, vector<2x32xf32>,
    %c0_83 = arith.constant 0 : index
    %173 = arith.index_cast %138 : i32 to index
    %c0_84 = arith.constant 0 : index
    %c0_85 = arith.constant 0 : index
    %174 = vector.load %arg4[%c0_83, %173, %c0_84, %c0_85] : memref<1x8x2x32xf32, #tpu.memory_space<vmem>>, vector<1x1x2x32xf32>
    %175 = vector.shape_cast %174 : vector<1x1x2x32xf32> to vector<2x32xf32>
    %176 = vector.shape_cast %170 : vector<2x32xf32> to vector<1x1x2x32xf32>
    tpu.vector_store %arg4[%c0_83, %173, %c0_84, %c0_85], %176 {strides = array<i32>} : memref<1x8x2x32xf32, #tpu.memory_space<vmem>>, vector<1x1x2x32xf32>,
    %c4_i32 = arith.constant 4 : i32
    %c7_i32_86 = arith.constant 7 : i32
    %177 = arith.muli %arg0, %c7_i32_86 : i32
    %c2_i32_87 = arith.constant 2 : i32
    %178 = arith.muli %c2_i32_87, %arg0 : i32
    %c1_i32_88 = arith.constant 1 : i32
    %179 = arith.subi %c1_i32_88, %178 : i32
    %180 = arith.muli %179, %c4_i32 : i32
    %181 = arith.addi %177, %180 : i32
    %c0_89 = arith.constant 0 : index
    %182 = arith.index_cast %181 : i32 to index
    %c0_90 = arith.constant 0 : index
    %c0_91 = arith.constant 0 : index
    %183 = vector.load %arg2[%c0_89, %182, %c0_90, %c0_91] : memref<1x8x2x128xf32, #tpu.memory_space<vmem>>, vector<1x1x2x128xf32>
    %184 = vector.shape_cast %183 : vector<1x1x2x128xf32> to vector<2x128xf32>
    %c0_92 = arith.constant 0 : index
    %c0_93 = arith.constant 0 : index
    %185 = vector.load %arg7[%c0_92, %c0_93] : memref<2x32xf32, #tpu.memory_space<vmem>>, vector<2x32xf32>
    %cst_94 = arith.constant dense<0.000000e+00> : vector<2x128xf32>
    %186 = tpu.matmul %185, %4, %cst_94 {dimension_numbers = #tpu.dot_dimension_numbers<[1], [0], [0], [1], [0, 0, 1, 1], [], []>} : vector<2x32xf32>, vector<32x128xf32>, vector<2x128xf32> -> vector<2x128xf32>
    %187 = arith.addf %184, %186 : vector<2x128xf32>
    %188 = vector.extract_strided_slice %187 {offsets = [0, 0], sizes = [2, 32], strides = [1, 1]} : vector<2x128xf32> to vector<2x32xf32>
    %189 = arith.negf %188 : vector<2x32xf32>
    %190 = math.exp %189 : vector<2x32xf32>
    %cst_95 = arith.constant 1.000000e+00 : f32
    %191 = vector.broadcast %cst_95 : f32 to vector<2x32xf32>
    %192 = arith.addf %191, %190 : vector<2x32xf32>
    %193 = arith.divf %191, %192 : vector<2x32xf32>
    %194 = vector.extract_strided_slice %187 {offsets = [0, 32], sizes = [2, 32], strides = [1, 1]} : vector<2x128xf32> to vector<2x32xf32>
    %195 = arith.negf %194 : vector<2x32xf32>
    %196 = math.exp %195 : vector<2x32xf32>
    %cst_96 = arith.constant 1.000000e+00 : f32
    %197 = vector.broadcast %cst_96 : f32 to vector<2x32xf32>
    %198 = arith.addf %197, %196 : vector<2x32xf32>
    %199 = arith.divf %197, %198 : vector<2x32xf32>
    %200 = vector.extract_strided_slice %187 {offsets = [0, 64], sizes = [2, 32], strides = [1, 1]} : vector<2x128xf32> to vector<2x32xf32>
    %201 = math.tanh %200 : vector<2x32xf32>
    %202 = vector.extract_strided_slice %187 {offsets = [0, 96], sizes = [2, 32], strides = [1, 1]} : vector<2x128xf32> to vector<2x32xf32>
    %203 = arith.negf %202 : vector<2x32xf32>
    %204 = math.exp %203 : vector<2x32xf32>
    %cst_97 = arith.constant 1.000000e+00 : f32
    %205 = vector.broadcast %cst_97 : f32 to vector<2x32xf32>
    %206 = arith.addf %205, %204 : vector<2x32xf32>
    %207 = arith.divf %205, %206 : vector<2x32xf32>
    %c0_98 = arith.constant 0 : index
    %c0_99 = arith.constant 0 : index
    %208 = vector.load %arg8[%c0_98, %c0_99] : memref<2x32xf32, #tpu.memory_space<vmem>>, vector<2x32xf32>
    %209 = arith.mulf %199, %208 : vector<2x32xf32>
    %210 = arith.mulf %193, %201 : vector<2x32xf32>
    %211 = arith.addf %209, %210 : vector<2x32xf32>
    %212 = math.tanh %211 : vector<2x32xf32>
    %213 = arith.mulf %207, %212 : vector<2x32xf32>
    %c0_100 = arith.constant 0 : index
    %c0_101 = arith.constant 0 : index
    %214 = vector.load %arg7[%c0_100, %c0_101] : memref<2x32xf32, #tpu.memory_space<vmem>>, vector<2x32xf32>
    tpu.vector_store %arg7[%c0_100, %c0_101], %213 {strides = array<i32>} : memref<2x32xf32, #tpu.memory_space<vmem>>, vector<2x32xf32>,
    %c0_102 = arith.constant 0 : index
    %c0_103 = arith.constant 0 : index
    %215 = vector.load %arg8[%c0_102, %c0_103] : memref<2x32xf32, #tpu.memory_space<vmem>>, vector<2x32xf32>
    tpu.vector_store %arg8[%c0_102, %c0_103], %211 {strides = array<i32>} : memref<2x32xf32, #tpu.memory_space<vmem>>, vector<2x32xf32>,
    %c0_104 = arith.constant 0 : index
    %216 = arith.index_cast %181 : i32 to index
    %c0_105 = arith.constant 0 : index
    %c0_106 = arith.constant 0 : index
    %217 = vector.load %arg4[%c0_104, %216, %c0_105, %c0_106] : memref<1x8x2x32xf32, #tpu.memory_space<vmem>>, vector<1x1x2x32xf32>
    %218 = vector.shape_cast %217 : vector<1x1x2x32xf32> to vector<2x32xf32>
    %219 = vector.shape_cast %213 : vector<2x32xf32> to vector<1x1x2x32xf32>
    tpu.vector_store %arg4[%c0_104, %216, %c0_105, %c0_106], %219 {strides = array<i32>} : memref<1x8x2x32xf32, #tpu.memory_space<vmem>>, vector<1x1x2x32xf32>,
    %c5_i32 = arith.constant 5 : i32
    %c7_i32_107 = arith.constant 7 : i32
    %220 = arith.muli %arg0, %c7_i32_107 : i32
    %c2_i32_108 = arith.constant 2 : i32
    %221 = arith.muli %c2_i32_108, %arg0 : i32
    %c1_i32_109 = arith.constant 1 : i32
    %222 = arith.subi %c1_i32_109, %221 : i32
    %223 = arith.muli %222, %c5_i32 : i32
    %224 = arith.addi %220, %223 : i32
    %c0_110 = arith.constant 0 : index
    %225 = arith.index_cast %224 : i32 to index
    %c0_111 = arith.constant 0 : index
    %c0_112 = arith.constant 0 : index
    %226 = vector.load %arg2[%c0_110, %225, %c0_111, %c0_112] : memref<1x8x2x128xf32, #tpu.memory_space<vmem>>, vector<1x1x2x128xf32>
    %227 = vector.shape_cast %226 : vector<1x1x2x128xf32> to vector<2x128xf32>
    %c0_113 = arith.constant 0 : index
    %c0_114 = arith.constant 0 : index
    %228 = vector.load %arg7[%c0_113, %c0_114] : memref<2x32xf32, #tpu.memory_space<vmem>>, vector<2x32xf32>
    %cst_115 = arith.constant dense<0.000000e+00> : vector<2x128xf32>
    %229 = tpu.matmul %228, %4, %cst_115 {dimension_numbers = #tpu.dot_dimension_numbers<[1], [0], [0], [1], [0, 0, 1, 1], [], []>} : vector<2x32xf32>, vector<32x128xf32>, vector<2x128xf32> -> vector<2x128xf32>
    %230 = arith.addf %227, %229 : vector<2x128xf32>
    %231 = vector.extract_strided_slice %230 {offsets = [0, 0], sizes = [2, 32], strides = [1, 1]} : vector<2x128xf32> to vector<2x32xf32>
    %232 = arith.negf %231 : vector<2x32xf32>
    %233 = math.exp %232 : vector<2x32xf32>
    %cst_116 = arith.constant 1.000000e+00 : f32
    %234 = vector.broadcast %cst_116 : f32 to vector<2x32xf32>
    %235 = arith.addf %234, %233 : vector<2x32xf32>
    %236 = arith.divf %234, %235 : vector<2x32xf32>
    %237 = vector.extract_strided_slice %230 {offsets = [0, 32], sizes = [2, 32], strides = [1, 1]} : vector<2x128xf32> to vector<2x32xf32>
    %238 = arith.negf %237 : vector<2x32xf32>
    %239 = math.exp %238 : vector<2x32xf32>
    %cst_117 = arith.constant 1.000000e+00 : f32
    %240 = vector.broadcast %cst_117 : f32 to vector<2x32xf32>
    %241 = arith.addf %240, %239 : vector<2x32xf32>
    %242 = arith.divf %240, %241 : vector<2x32xf32>
    %243 = vector.extract_strided_slice %230 {offsets = [0, 64], sizes = [2, 32], strides = [1, 1]} : vector<2x128xf32> to vector<2x32xf32>
    %244 = math.tanh %243 : vector<2x32xf32>
    %245 = vector.extract_strided_slice %230 {offsets = [0, 96], sizes = [2, 32], strides = [1, 1]} : vector<2x128xf32> to vector<2x32xf32>
    %246 = arith.negf %245 : vector<2x32xf32>
    %247 = math.exp %246 : vector<2x32xf32>
    %cst_118 = arith.constant 1.000000e+00 : f32
    %248 = vector.broadcast %cst_118 : f32 to vector<2x32xf32>
    %249 = arith.addf %248, %247 : vector<2x32xf32>
    %250 = arith.divf %248, %249 : vector<2x32xf32>
    %c0_119 = arith.constant 0 : index
    %c0_120 = arith.constant 0 : index
    %251 = vector.load %arg8[%c0_119, %c0_120] : memref<2x32xf32, #tpu.memory_space<vmem>>, vector<2x32xf32>
    %252 = arith.mulf %242, %251 : vector<2x32xf32>
    %253 = arith.mulf %236, %244 : vector<2x32xf32>
    %254 = arith.addf %252, %253 : vector<2x32xf32>
    %255 = math.tanh %254 : vector<2x32xf32>
    %256 = arith.mulf %250, %255 : vector<2x32xf32>
    %c0_121 = arith.constant 0 : index
    %c0_122 = arith.constant 0 : index
    %257 = vector.load %arg7[%c0_121, %c0_122] : memref<2x32xf32, #tpu.memory_space<vmem>>, vector<2x32xf32>
    tpu.vector_store %arg7[%c0_121, %c0_122], %256 {strides = array<i32>} : memref<2x32xf32, #tpu.memory_space<vmem>>, vector<2x32xf32>,
    %c0_123 = arith.constant 0 : index
    %c0_124 = arith.constant 0 : index
    %258 = vector.load %arg8[%c0_123, %c0_124] : memref<2x32xf32, #tpu.memory_space<vmem>>, vector<2x32xf32>
    tpu.vector_store %arg8[%c0_123, %c0_124], %254 {strides = array<i32>} : memref<2x32xf32, #tpu.memory_space<vmem>>, vector<2x32xf32>,
    %c0_125 = arith.constant 0 : index
    %259 = arith.index_cast %224 : i32 to index
    %c0_126 = arith.constant 0 : index
    %c0_127 = arith.constant 0 : index
    %260 = vector.load %arg4[%c0_125, %259, %c0_126, %c0_127] : memref<1x8x2x32xf32, #tpu.memory_space<vmem>>, vector<1x1x2x32xf32>
    %261 = vector.shape_cast %260 : vector<1x1x2x32xf32> to vector<2x32xf32>
    %262 = vector.shape_cast %256 : vector<2x32xf32> to vector<1x1x2x32xf32>
    tpu.vector_store %arg4[%c0_125, %259, %c0_126, %c0_127], %262 {strides = array<i32>} : memref<1x8x2x32xf32, #tpu.memory_space<vmem>>, vector<1x1x2x32xf32>,
    %c6_i32 = arith.constant 6 : i32
    %c7_i32_128 = arith.constant 7 : i32
    %263 = arith.muli %arg0, %c7_i32_128 : i32
    %c2_i32_129 = arith.constant 2 : i32
    %264 = arith.muli %c2_i32_129, %arg0 : i32
    %c1_i32_130 = arith.constant 1 : i32
    %265 = arith.subi %c1_i32_130, %264 : i32
    %266 = arith.muli %265, %c6_i32 : i32
    %267 = arith.addi %263, %266 : i32
    %c0_131 = arith.constant 0 : index
    %268 = arith.index_cast %267 : i32 to index
    %c0_132 = arith.constant 0 : index
    %c0_133 = arith.constant 0 : index
    %269 = vector.load %arg2[%c0_131, %268, %c0_132, %c0_133] : memref<1x8x2x128xf32, #tpu.memory_space<vmem>>, vector<1x1x2x128xf32>
    %270 = vector.shape_cast %269 : vector<1x1x2x128xf32> to vector<2x128xf32>
    %c0_134 = arith.constant 0 : index
    %c0_135 = arith.constant 0 : index
    %271 = vector.load %arg7[%c0_134, %c0_135] : memref<2x32xf32, #tpu.memory_space<vmem>>, vector<2x32xf32>
    %cst_136 = arith.constant dense<0.000000e+00> : vector<2x128xf32>
    %272 = tpu.matmul %271, %4, %cst_136 {dimension_numbers = #tpu.dot_dimension_numbers<[1], [0], [0], [1], [0, 0, 1, 1], [], []>} : vector<2x32xf32>, vector<32x128xf32>, vector<2x128xf32> -> vector<2x128xf32>
    %273 = arith.addf %270, %272 : vector<2x128xf32>
    %274 = vector.extract_strided_slice %273 {offsets = [0, 0], sizes = [2, 32], strides = [1, 1]} : vector<2x128xf32> to vector<2x32xf32>
    %275 = arith.negf %274 : vector<2x32xf32>
    %276 = math.exp %275 : vector<2x32xf32>
    %cst_137 = arith.constant 1.000000e+00 : f32
    %277 = vector.broadcast %cst_137 : f32 to vector<2x32xf32>
    %278 = arith.addf %277, %276 : vector<2x32xf32>
    %279 = arith.divf %277, %278 : vector<2x32xf32>
    %280 = vector.extract_strided_slice %273 {offsets = [0, 32], sizes = [2, 32], strides = [1, 1]} : vector<2x128xf32> to vector<2x32xf32>
    %281 = arith.negf %280 : vector<2x32xf32>
    %282 = math.exp %281 : vector<2x32xf32>
    %cst_138 = arith.constant 1.000000e+00 : f32
    %283 = vector.broadcast %cst_138 : f32 to vector<2x32xf32>
    %284 = arith.addf %283, %282 : vector<2x32xf32>
    %285 = arith.divf %283, %284 : vector<2x32xf32>
    %286 = vector.extract_strided_slice %273 {offsets = [0, 64], sizes = [2, 32], strides = [1, 1]} : vector<2x128xf32> to vector<2x32xf32>
    %287 = math.tanh %286 : vector<2x32xf32>
    %288 = vector.extract_strided_slice %273 {offsets = [0, 96], sizes = [2, 32], strides = [1, 1]} : vector<2x128xf32> to vector<2x32xf32>
    %289 = arith.negf %288 : vector<2x32xf32>
    %290 = math.exp %289 : vector<2x32xf32>
    %cst_139 = arith.constant 1.000000e+00 : f32
    %291 = vector.broadcast %cst_139 : f32 to vector<2x32xf32>
    %292 = arith.addf %291, %290 : vector<2x32xf32>
    %293 = arith.divf %291, %292 : vector<2x32xf32>
    %c0_140 = arith.constant 0 : index
    %c0_141 = arith.constant 0 : index
    %294 = vector.load %arg8[%c0_140, %c0_141] : memref<2x32xf32, #tpu.memory_space<vmem>>, vector<2x32xf32>
    %295 = arith.mulf %285, %294 : vector<2x32xf32>
    %296 = arith.mulf %279, %287 : vector<2x32xf32>
    %297 = arith.addf %295, %296 : vector<2x32xf32>
    %298 = math.tanh %297 : vector<2x32xf32>
    %299 = arith.mulf %293, %298 : vector<2x32xf32>
    %c0_142 = arith.constant 0 : index
    %c0_143 = arith.constant 0 : index
    %300 = vector.load %arg7[%c0_142, %c0_143] : memref<2x32xf32, #tpu.memory_space<vmem>>, vector<2x32xf32>
    tpu.vector_store %arg7[%c0_142, %c0_143], %299 {strides = array<i32>} : memref<2x32xf32, #tpu.memory_space<vmem>>, vector<2x32xf32>,
    %c0_144 = arith.constant 0 : index
    %c0_145 = arith.constant 0 : index
    %301 = vector.load %arg8[%c0_144, %c0_145] : memref<2x32xf32, #tpu.memory_space<vmem>>, vector<2x32xf32>
    tpu.vector_store %arg8[%c0_144, %c0_145], %297 {strides = array<i32>} : memref<2x32xf32, #tpu.memory_space<vmem>>, vector<2x32xf32>,
    %c0_146 = arith.constant 0 : index
    %302 = arith.index_cast %267 : i32 to index
    %c0_147 = arith.constant 0 : index
    %c0_148 = arith.constant 0 : index
    %303 = vector.load %arg4[%c0_146, %302, %c0_147, %c0_148] : memref<1x8x2x32xf32, #tpu.memory_space<vmem>>, vector<1x1x2x32xf32>
    %304 = vector.shape_cast %303 : vector<1x1x2x32xf32> to vector<2x32xf32>
    %305 = vector.shape_cast %299 : vector<2x32xf32> to vector<1x1x2x32xf32>
    tpu.vector_store %arg4[%c0_146, %302, %c0_147, %c0_148], %305 {strides = array<i32>} : memref<1x8x2x32xf32, #tpu.memory_space<vmem>>, vector<1x1x2x32xf32>,
    %c7_i32_149 = arith.constant 7 : i32
    %c7_i32_150 = arith.constant 7 : i32
    %306 = arith.muli %arg0, %c7_i32_150 : i32
    %c2_i32_151 = arith.constant 2 : i32
    %307 = arith.muli %c2_i32_151, %arg0 : i32
    %c1_i32_152 = arith.constant 1 : i32
    %308 = arith.subi %c1_i32_152, %307 : i32
    %309 = arith.muli %308, %c7_i32_149 : i32
    %310 = arith.addi %306, %309 : i32
    %c0_153 = arith.constant 0 : index
    %311 = arith.index_cast %310 : i32 to index
    %c0_154 = arith.constant 0 : index
    %c0_155 = arith.constant 0 : index
    %312 = vector.load %arg2[%c0_153, %311, %c0_154, %c0_155] : memref<1x8x2x128xf32, #tpu.memory_space<vmem>>, vector<1x1x2x128xf32>
    %313 = vector.shape_cast %312 : vector<1x1x2x128xf32> to vector<2x128xf32>
    %c0_156 = arith.constant 0 : index
    %c0_157 = arith.constant 0 : index
    %314 = vector.load %arg7[%c0_156, %c0_157] : memref<2x32xf32, #tpu.memory_space<vmem>>, vector<2x32xf32>
    %cst_158 = arith.constant dense<0.000000e+00> : vector<2x128xf32>
    %315 = tpu.matmul %314, %4, %cst_158 {dimension_numbers = #tpu.dot_dimension_numbers<[1], [0], [0], [1], [0, 0, 1, 1], [], []>} : vector<2x32xf32>, vector<32x128xf32>, vector<2x128xf32> -> vector<2x128xf32>
    %316 = arith.addf %313, %315 : vector<2x128xf32>
    %317 = vector.extract_strided_slice %316 {offsets = [0, 0], sizes = [2, 32], strides = [1, 1]} : vector<2x128xf32> to vector<2x32xf32>
    %318 = arith.negf %317 : vector<2x32xf32>
    %319 = math.exp %318 : vector<2x32xf32>
    %cst_159 = arith.constant 1.000000e+00 : f32
    %320 = vector.broadcast %cst_159 : f32 to vector<2x32xf32>
    %321 = arith.addf %320, %319 : vector<2x32xf32>
    %322 = arith.divf %320, %321 : vector<2x32xf32>
    %323 = vector.extract_strided_slice %316 {offsets = [0, 32], sizes = [2, 32], strides = [1, 1]} : vector<2x128xf32> to vector<2x32xf32>
    %324 = arith.negf %323 : vector<2x32xf32>
    %325 = math.exp %324 : vector<2x32xf32>
    %cst_160 = arith.constant 1.000000e+00 : f32
    %326 = vector.broadcast %cst_160 : f32 to vector<2x32xf32>
    %327 = arith.addf %326, %325 : vector<2x32xf32>
    %328 = arith.divf %326, %327 : vector<2x32xf32>
    %329 = vector.extract_strided_slice %316 {offsets = [0, 64], sizes = [2, 32], strides = [1, 1]} : vector<2x128xf32> to vector<2x32xf32>
    %330 = math.tanh %329 : vector<2x32xf32>
    %331 = vector.extract_strided_slice %316 {offsets = [0, 96], sizes = [2, 32], strides = [1, 1]} : vector<2x128xf32> to vector<2x32xf32>
    %332 = arith.negf %331 : vector<2x32xf32>
    %333 = math.exp %332 : vector<2x32xf32>
    %cst_161 = arith.constant 1.000000e+00 : f32
    %334 = vector.broadcast %cst_161 : f32 to vector<2x32xf32>
    %335 = arith.addf %334, %333 : vector<2x32xf32>
    %336 = arith.divf %334, %335 : vector<2x32xf32>
    %c0_162 = arith.constant 0 : index
    %c0_163 = arith.constant 0 : index
    %337 = vector.load %arg8[%c0_162, %c0_163] : memref<2x32xf32, #tpu.memory_space<vmem>>, vector<2x32xf32>
    %338 = arith.mulf %328, %337 : vector<2x32xf32>
    %339 = arith.mulf %322, %330 : vector<2x32xf32>
    %340 = arith.addf %338, %339 : vector<2x32xf32>
    %341 = math.tanh %340 : vector<2x32xf32>
    %342 = arith.mulf %336, %341 : vector<2x32xf32>
    %c0_164 = arith.constant 0 : index
    %c0_165 = arith.constant 0 : index
    %343 = vector.load %arg7[%c0_164, %c0_165] : memref<2x32xf32, #tpu.memory_space<vmem>>, vector<2x32xf32>
    tpu.vector_store %arg7[%c0_164, %c0_165], %342 {strides = array<i32>} : memref<2x32xf32, #tpu.memory_space<vmem>>, vector<2x32xf32>,
    %c0_166 = arith.constant 0 : index
    %c0_167 = arith.constant 0 : index
    %344 = vector.load %arg8[%c0_166, %c0_167] : memref<2x32xf32, #tpu.memory_space<vmem>>, vector<2x32xf32>
    tpu.vector_store %arg8[%c0_166, %c0_167], %340 {strides = array<i32>} : memref<2x32xf32, #tpu.memory_space<vmem>>, vector<2x32xf32>,
    %c0_168 = arith.constant 0 : index
    %345 = arith.index_cast %310 : i32 to index
    %c0_169 = arith.constant 0 : index
    %c0_170 = arith.constant 0 : index
    %346 = vector.load %arg4[%c0_168, %345, %c0_169, %c0_170] : memref<1x8x2x32xf32, #tpu.memory_space<vmem>>, vector<1x1x2x32xf32>
    %347 = vector.shape_cast %346 : vector<1x1x2x32xf32> to vector<2x32xf32>
    %348 = vector.shape_cast %342 : vector<2x32xf32> to vector<1x1x2x32xf32>
    tpu.vector_store %arg4[%c0_168, %345, %c0_169, %c0_170], %348 {strides = array<i32>} : memref<1x8x2x32xf32, #tpu.memory_space<vmem>>, vector<1x1x2x32xf32>,
    %c8_i32 = arith.constant 8 : i32
    %c0_171 = arith.constant 0 : index
    %c0_172 = arith.constant 0 : index
    %349 = vector.load %arg7[%c0_171, %c0_172] : memref<2x32xf32, #tpu.memory_space<vmem>>, vector<2x32xf32>
    %c0_173 = arith.constant 0 : index
    %c0_174 = arith.constant 0 : index
    %c0_175 = arith.constant 0 : index
    %350 = vector.load %arg5[%c0_173, %c0_174, %c0_175] : memref<1x2x32xf32, #tpu.memory_space<vmem>>, vector<1x2x32xf32>
    %351 = vector.shape_cast %350 : vector<1x2x32xf32> to vector<2x32xf32>
    %352 = vector.shape_cast %349 : vector<2x32xf32> to vector<1x2x32xf32>
    tpu.vector_store %arg5[%c0_173, %c0_174, %c0_175], %352 {strides = array<i32>} : memref<1x2x32xf32, #tpu.memory_space<vmem>>, vector<1x2x32xf32>,
    %c0_176 = arith.constant 0 : index
    %c0_177 = arith.constant 0 : index
    %353 = vector.load %arg8[%c0_176, %c0_177] : memref<2x32xf32, #tpu.memory_space<vmem>>, vector<2x32xf32>
    %c0_178 = arith.constant 0 : index
    %c0_179 = arith.constant 0 : index
    %c0_180 = arith.constant 0 : index
    %354 = vector.load %arg6[%c0_178, %c0_179, %c0_180] : memref<1x2x32xf32, #tpu.memory_space<vmem>>, vector<1x2x32xf32>
    %355 = vector.shape_cast %354 : vector<1x2x32xf32> to vector<2x32xf32>
    %356 = vector.shape_cast %353 : vector<2x32xf32> to vector<1x2x32xf32>
    tpu.vector_store %arg6[%c0_178, %c0_179, %c0_180], %356 {strides = array<i32>} : memref<1x2x32xf32, #tpu.memory_space<vmem>>, vector<1x2x32xf32>,
    return
  }
  func.func @transform_0(%arg0: i32, %arg1: i32) -> (i32, i32, i32, i32) {
    %c0_i32 = arith.constant 0 : i32
    %0 = arith.muli %arg0, %c0_i32 : i32
    %c2_i32 = arith.constant 2 : i32
    %1 = arith.muli %c2_i32, %arg0 : i32
    %c1_i32 = arith.constant 1 : i32
    %2 = arith.subi %c1_i32, %1 : i32
    %3 = arith.muli %2, %arg1 : i32
    %4 = arith.addi %0, %3 : i32
    %c0_i32_0 = arith.constant 0 : i32
    %c0_i32_1 = arith.constant 0 : i32
    %c0_i32_2 = arith.constant 0 : i32
    return %arg0, %4, %c0_i32_0, %c0_i32_1 : i32, i32, i32, i32
  }
  func.func @transform_1(%arg0: i32, %arg1: i32) -> (i32, i32, i32) {
    %c0_i32 = arith.constant 0 : i32
    %c0_i32_0 = arith.constant 0 : i32
    %c0_i32_1 = arith.constant 0 : i32
    return %arg0, %c0_i32, %c0_i32_0 : i32, i32, i32
  }
  func.func @transform_2(%arg0: i32, %arg1: i32) -> (i32, i32, i32, i32) {
    %c0_i32 = arith.constant 0 : i32
    %0 = arith.muli %arg0, %c0_i32 : i32
    %c2_i32 = arith.constant 2 : i32
    %1 = arith.muli %c2_i32, %arg0 : i32
    %c1_i32 = arith.constant 1 : i32
    %2 = arith.subi %c1_i32, %1 : i32
    %3 = arith.muli %2, %arg1 : i32
    %4 = arith.addi %0, %3 : i32
    %c0_i32_0 = arith.constant 0 : i32
    %c0_i32_1 = arith.constant 0 : i32
    %c0_i32_2 = arith.constant 0 : i32
    return %arg0, %4, %c0_i32_0, %c0_i32_1 : i32, i32, i32, i32
  }
  func.func @transform_3(%arg0: i32, %arg1: i32) -> (i32, i32, i32) {
    %c0_i32 = arith.constant 0 : i32
    %c0_i32_0 = arith.constant 0 : i32
    %c0_i32_1 = arith.constant 0 : i32
    return %arg0, %c0_i32, %c0_i32_0 : i32, i32, i32
  }
  func.func @transform_4(%arg0: i32, %arg1: i32) -> (i32, i32, i32) {
    %c0_i32 = arith.constant 0 : i32
    %c0_i32_0 = arith.constant 0 : i32
    %c0_i32_1 = arith.constant 0 : i32
    return %arg0, %c0_i32, %c0_i32_0 : i32, i32, i32
  }
}

</mosaic_0001>

<bundles_post_ra>
// kernel: encoder_forward.4
= control target key start
LH: loop header
LB: loop body
LE: loop exit
PB: predicated region body
PF: predicated region fallthrough
CT: control target
= control target key end

     0   :  { %s411_s12 = smov 0   ;;  %s437_s0 = inlined_call_operand.vmem [shape: f32[16,16], index: 0, kind: input, shape index: {}]   ;;  %s438_s1 = inlined_call_operand.vmem [shape: f32[2,16,128], index: 1, kind: input, shape index: {}]   ;;  %s439_s2 = inlined_call_operand.vmem [shape: f32[2,1,128], index: 2, kind: input, shape index: {}]   ;;  %s440_s3 = inlined_call_operand.vmem [shape: f32[2,16,128], index: 3, kind: output, shape index: {}]  }
   0x1 LB: > { %s344_s13 = sadd.s32 4294967295, %s389_s12   ;;  %p348_p0 = scmp.ge.s32.totalorder %s389_s12, 1  ;;  %s389_s12 = sphi %s411_s12, %s13_s12  }
   0x2   : > { %p145_p1 = scmp.lt.s32.totalorder %s389_s12, 3 }
   0x4   : > { %p146_p2 = pnand %p348_p0, %p145_p1 }
   0x5   : > { %p172_p3 = scmp.lt.s32.totalorder (!%p146_p2), %s344_s13, 1  ;;  %v185_v0 = vld [vmem:[%s437_s0] sm:$0xff] (!%p146_p2)  ;;  %vm196_vm0 = vcmask (!%p146_p2), 130048   ;;  %v186_v4 = vld [vmem:[%s437_s0 + $0x8] sm:$0xff] (!%p146_p2) }
   0x6   : > { %149 = sbr.rel (%p146_p2) target bundleno = 239 (0xef), region = 32  ;;  %368 = vmatprep.mubr.msk.f32.mxu0 (!%p146_p2), %vm196_vm0, %v185_v0 }
   0xd   : > { %s442_s13 = smov (!%p172_p3, %s344_s13), 1 }
   0xe   : > { %s358_s16 = sshll.u32 %s442_s13, 4  ;;  %s179_s24 = scalar_lea.vmem %s439_s2, %s442_s13 }
   0xf   : > { %s176_s19 = scalar_lea.vmem %s438_s1, %s358_s16  ;;  %v353_v5 = vld [vmem:[%s179_s24] ss:$0 sm:$0xff]  ;;  %s184_s27 = scalar_lea.vmem %s440_s3, %s358_s16 }
  0x10   : > { %v187_v1 = vld [vmem:[%s176_s19] sm:$0xff]  ;;  %v188_v2 = vld [vmem:[%s176_s19 + $0x8] sm:$0xff] }
  0x11   : > { %v371_v3 = vpack.c.bf16 %v188_v2, %v187_v1 }
  0x13   : > { %372 = vmatprep.subr.bf16.mxu0 %v371_v3 }
  0x14   : > { %374 = vmatpush3.bf16.msra.mxu0 %v371_v3 }
  0x17   : > { %369 = vmatmul.mubr.msk.f32.vlgmr.msra.gmra.mrb[0].mxu0 %vm196_vm0, %v186_v4 }
  0xea   : > { %v370_v6 = vpop.f32.mrb[0].mxu0 }
  0xeb   : > { %v275_v7 = vadd.f32 %v370_v6, %v353_v5  ;;  %v269_v8 = vpop.f32.mrb[1].mxu0 }
  0xec   : > { %v270_v9 = vadd.f32 %v353_v5, %v269_v8 }
  0xed   : > { %279 = vst [vmem:[%s184_s27 + $0x8] sm:$0xff] %v275_v7 }
  0xee   : > { %278 = vst [vmem:[%s184_s27] sm:$0xff] %v270_v9 }
  0xef PF: > { %s13_s12 = sadd.s32 1, %s389_s12  }
  0xf0   : > { %p10_p4 = scmp.ge.s32.totalorder %s13_s12, 4  }
  0xf2   :  { %12 = sbr.rel (!%p10_p4) target bundleno = 1 (0x1), region = 65 }

// kernel: encoder_forward.6
= control target key start
LH: loop header
LB: loop body
LE: loop exit
PB: predicated region body
PF: predicated region fallthrough
CT: control target
= control target key end

     0   :  { %s447_s12 = smov 0   ;;  %s480_s0 = inlined_call_operand.vmem [shape: f32[16,64], index: 0, kind: input, shape index: {}]   ;;  %s481_s1 = inlined_call_operand.vmem [shape: f32[2,64,128], index: 1, kind: input, shape index: {}]   ;;  %s482_s2 = inlined_call_operand.vmem [shape: f32[2,1,128], index: 2, kind: input, shape index: {}]   ;;  %s483_s3 = inlined_call_operand.vmem [shape: f32[2,16,128], index: 3, kind: output, shape index: {}]  }
   0x1 LB: > { %s350_s13 = sadd.s32 4294967295, %s425_s12   ;;  %p354_p0 = scmp.ge.s32.totalorder %s425_s12, 1  ;;  %s425_s12 = sphi %s447_s12, %s13_s12  }
   0x2   : > { %p145_p1 = scmp.lt.s32.totalorder %s425_s12, 3 }
   0x4   : > { %p146_p2 = pnand %p354_p0, %p145_p1 }
   0x5   : > { %p172_p3 = scmp.lt.s32.totalorder (!%p146_p2), %s350_s13, 1  ;;  %v185_v0 = vld [vmem:[%s480_s0] sm:$0xff] (!%p146_p2)  ;;  %vm202_vm0 = vcmask (!%p146_p2), 523264   ;;  %v186_v13 = vld [vmem:[%s480_s0 + $0x8] sm:$0xff] (!%p146_p2) }
   0x6   : > { %149 = sbr.rel (%p146_p2) target bundleno = 251 (0xfb), region = 32  ;;  %392 = vmatprep.mubr.msk.f32.mxu0 (!%p146_p2), %vm202_vm0, %v185_v0 }
   0xd   : > { %s485_s13 = smov (!%p172_p3, %s350_s13), 1 }
   0xe   : > { %s364_s16 = sshll.u32 %s485_s13, 6  ;;  %s179_s24 = scalar_lea.vmem %s482_s2, %s485_s13 }
   0xf   : > { %s176_s19 = scalar_lea.vmem %s481_s1, %s364_s16  ;;  %s365_s25 = sshll.u32 %s485_s13, 4  ;;  %v359_v14 = vld [vmem:[%s179_s24] ss:$0 sm:$0xff] }
  0x10   : > { %v187_v1 = vld [vmem:[%s176_s19] sm:$0xff]  ;;  %v188_v2 = vld [vmem:[%s176_s19 + $0x8] sm:$0xff]  ;;  %v189_v3 = vld [vmem:[%s176_s19 + $0x10] sm:$0xff]  ;;  %s184_s28 = scalar_lea.vmem %s483_s3, %s365_s25 }
  0x11   : > { %v395_v4 = vpack.c.bf16 %v188_v2, %v187_v1  ;;  %v190_v5 = vld [vmem:[%s176_s19 + $0x18] sm:$0xff]  ;;  %v191_v7 = vld [vmem:[%s176_s19 + $0x20] sm:$0xff]  ;;  %v192_v8 = vld [vmem:[%s176_s19 + $0x28] sm:$0xff] }
  0x12   : > { %v399_v6 = vpack.c.bf16 %v190_v5, %v189_v3  ;;  %v403_v9 = vpack.c.bf16 %v192_v8, %v191_v7  ;;  %v193_v10 = vld [vmem:[%s176_s19 + $0x30] sm:$0xff]  ;;  %v194_v11 = vld [vmem:[%s176_s19 + $0x38] sm:$0xff] }
  0x13   : > { %396 = vmatprep.subr.bf16.mxu0 %v395_v4  ;;  %v407_v12 = vpack.c.bf16 %v194_v11, %v193_v10 }
  0x14   : > { %398 = vmatpush3.bf16.msra.mxu0 %v395_v4 }
  0x15   : > { %400 = vmatprep.subr.bf16.mxu0 %v399_v6 }
  0x18   : > { %402 = vmatpush3.bf16.msra.mxu0 %v399_v6 }
  0x19   : > { %404 = vmatprep.subr.bf16.mxu0 %v403_v9 }
  0x1c   : > { %406 = vmatpush3.bf16.msra.mxu0 %v403_v9 }
  0x1d   : > { %408 = vmatprep.subr.bf16.mxu0 %v407_v12 }
  0x20   : > { %410 = vmatpush3.bf16.msra.mxu0 %v407_v12 }
  0x23   : > { %393 = vmatmul.mubr.msk.f32.vlgmr.msra.gmra.mrb[0].mxu0 %vm202_vm0, %v186_v13 }
  0xf6   : > { %v394_v15 = vpop.f32.mrb[0].mxu0 }
  0xf7   : > { %v281_v16 = vadd.f32 %v394_v15, %v359_v14  ;;  %v275_v17 = vpop.f32.mrb[1].mxu0 }
  0xf8   : > { %v276_v18 = vadd.f32 %v359_v14, %v275_v17 }
  0xf9   : > { %285 = vst [vmem:[%s184_s28 + $0x8] sm:$0xff] %v281_v16 }
  0xfa   : > { %284 = vst [vmem:[%s184_s28] sm:$0xff] %v276_v18 }
  0xfb PF: > { %s13_s12 = sadd.s32 1, %s425_s12  }
  0xfc   : > { %p10_p4 = scmp.ge.s32.totalorder %s13_s12, 4  }
  0xfe   :  { %12 = sbr.rel (!%p10_p4) target bundleno = 1 (0x1), region = 65 }

// kernel: encoder_forward.5
= control target key start
LH: loop header
LB: loop body
LE: loop exit
PB: predicated region body
PF: predicated region fallthrough
CT: control target
= control target key end

     0   :  { %s1917_s15 = smov 0   ;;  %s1919_s16 = smov 0   ;;  %s2201_s0 = inlined_call_operand.vmem [shape: f32[2,8,2,128], index: 0, kind: input, shape index: {}]   ;;  %s2202_s1 = inlined_call_operand.vmem [shape: f32[2,32,128], index: 1, kind: input, shape index: {}]   ;;  %s2203_s2 = inlined_call_operand.vmem [shape: f32[2,8,2,32], index: 2, kind: output, shape index: {0}]   ;;  %s2204_s3 = inlined_call_operand.vmem [shape: f32[2,2,32], index: 3, kind: output, shape index: {1}]   ;;  %s2205_s4 = inlined_call_operand.vmem [shape: f32[2,2,32], index: 4, kind: output, shape index: {2}]  }
   0x1   :  { %s1921_s17 = smov 0  }
   0x2 LB: > { %s27_s18 = sadd.s32 1, %s1880_s16  ;;  %p1549_p0 = scmp.ge.s32.totalorder %s1884_s17, 1  ;;  %s1884_s17 = sphi %s1921_s17, %s15_s17   ;;  %s1880_s16 = sphi %s1919_s16, %s2207_s16   ;;  %s1876_s15 = sphi %s1917_s15, %s2206_s15  }
   0x3   : > { %p29_p1 = scmp.ge.s32.totalorder %s27_s18, 2  ;;  %p216_p2 = scmp.lt.s32.totalorder %s1884_s17, 3 }
   0x5   : > { %s2209_s18 = smov (%p29_p1, %s27_s18), 0  ;;  %p217_p3 = pnand %p1549_p0, %p216_p2 }
   0x6   : > { %p273_p4 = scmp.lt.s32.totalorder (!%p217_p3), %s1876_s15, 1  ;;  %vm318_vm0 = vcmask (!%p217_p3), 254976   ;;  %v1886_v0 = vmov (!%p217_p3), 0.0|0.0   ;;  %v1887_v1 = vmov (!%p217_p3), 0.0   ;;  %vm1888_vm1 = vmmov (!%p217_p3), 0   ;;  %s1560_s25 = smul.u32 (!%p217_p3), 14, %s1876_s15 }
   0x7   : > { %220 = sbr.rel (%p217_p3) target bundleno = 5709 (0x164d), region = 28  ;;  %1720 = vmatprep.subr.bf16.mxu0 (!%p217_p3), %v1886_v0  ;;  %319 = vst.msk [vmem:[#allocation2] sm:$0x3] (!%p217_p3), %vm318_vm0, %v1887_v1  ;;  %320 = vst.msk [vmem:[#allocation3] sm:$0x3] (!%p217_p3), %vm318_vm0, %v1887_v1  ;;  %1640 = vmatprep.mubr.msk.f32.mxu0 (!%p217_p3), %vm1888_vm1, %v1887_v1  ;;  %vm330_vm2 = vcmask (!%p217_p3), 261120  }
   0x8   : > { %1726 = vmatprep.subr.bf16.mxu1 (!%p217_p3), %v1886_v0  ;;  %1651 = vmatprep.mubr.msk.f32.mxu1 (!%p217_p3), %vm1888_vm1, %v1887_v1  ;;  %s1889_s30 = smov (!%p217_p3), 64   ;;  %s1890_s5 = smov (!%p217_p3), 32  }
   0x9   : > { %s1891_s6 = smov (!%p217_p3), 96   ;;  %s1563_s11 = sshll.u32 (!%p217_p3), %s1876_s15, 1 }
   0xa   : > { %s2015_s12 = smul.u32 (!%p217_p3), 7, %s1876_s15  ;;  %s2017_s13 = ssub.s32 (!%p217_p3), 1, %s1563_s11 }
   0xb   : > { %s1567_s22 = sshll.u32 (!%p217_p3), %s2017_s13, 1  ;;  %s690_s27 = smul.u32 (!%p217_p3), 3, %s2017_s13 }
   0xc   : > { %s449_s14 = sadd.s32 (!%p217_p3), %s2017_s13, %s2015_s12  ;;  %s1574_s11 = sshll.u32 (!%p217_p3), %s2017_s13, 2 }
   0xe   : > { %s1946_s19 = scalar_select %p273_p4, %s1876_s15, 1  ;;  %v329_v8 = vld [vmem:[#allocation2] sm:$0x3]  ;;  %v412_v14 = vld [vmem:[#allocation3] sm:$0x3] }
  0x10   : > { %s1590_s20 = sshll.u32 %s1946_s19, 5  ;;  %s1589_s24 = sshll.u32 %s1946_s19, 4 }
  0x11   : > { %s289_s23 = scalar_lea.vmem %s2202_s1, %s1590_s20  ;;  %s1981_s28 = scalar_lea.vmem %s2201_s0, %s1589_s24 }
  0x12   : > { %v321_v2 = vld [vmem:[%s289_s23] sm:$0xff]  ;;  %v322_v3 = vld [vmem:[%s289_s23 + $0x8] sm:$0xff]  ;;  %v323_v4 = vld [vmem:[%s289_s23 + $0x10] sm:$0xff]  ;;  %s327_s29 = scalar_lea.vmem %s1981_s28, %s1560_s25  ;;  %s1999_s9 = scalar_lea.vmem %s2203_s2, %s1589_s24 }
  0x13   : > { %v1955_v5 = vpack.c.bf16 %v322_v3, %v321_v2  ;;  %v324_v6 = vld [vmem:[%s289_s23 + $0x18] sm:$0xff]  ;;  %v328_v9 = vld [vmem:[%s327_s29] sm:$0x3]  ;;  %s445_s10 = scalar_lea.vmem %s1999_s9, %s1560_s25  ;;  %s2021_s20 = sshll.u32 %s449_s14, 1 }
  0x14   : > { %v1958_v7 = vpack.c.bf16 %v324_v6, %v323_v4  ;;  %s451_s21 = scalar_lea.vmem %s1981_s28, %s2021_s20  ;;  %s567_s15 = scalar_lea.vmem %s1999_s9, %s2021_s20 }
  0x15   : > { %1722 = vmatpush3.bf16.msra.mxu0 %v1955_v5  ;;  %1728 = vmatpush3.bf16.msra.mxu1 %v1955_v5  ;;  %v452_v32 = vld [vmem:[%s451_s21] sm:$0x3]  ;;  %s2045_s23 = sadd.s32 %s1567_s22, %s2015_s12  ;;  %s2072_s29 = sadd.s32 %s690_s27, %s2015_s12 }
  0x16   : > { %1723 = vmatprep.subr.bf16.mxu0 %v1886_v0  ;;  %1729 = vmatprep.subr.bf16.mxu1 %v1886_v0  ;;  %s1568_s24 = sshll.u32 %s2045_s23, 1  ;;  %s1571_s7 = sshll.u32 %s2072_s29, 1 }
  0x17   : > { %s572_s25 = scalar_lea.vmem %s1981_s28, %s1568_s24  ;;  %s688_s26 = scalar_lea.vmem %s1999_s9, %s1568_s24 }
  0x18   : > { %v573_v54 = vld [vmem:[%s572_s25] sm:$0x3]  ;;  %s693_s8 = scalar_lea.vmem %s1981_s28, %s1571_s7  ;;  %s2098_s14 = sadd.s32 %s1574_s11, %s2015_s12 }
  0x19   : > { %1725 = vmatpush3.bf16.msra.mxu0 %v1958_v7  ;;  %1731 = vmatpush3.bf16.msra.mxu1 %v1958_v7  ;;  %s1575_s20 = sshll.u32 %s2098_s14, 1  ;;  %s932_s22 = smul.u32 5, %s2017_s13 }
  0x1a   : > { %1732 = vmatprep.subr.bf16.mxu0 %v1886_v0  ;;  %1738 = vmatprep.subr.bf16.mxu1 %v1886_v0  ;;  %s814_s21 = scalar_lea.vmem %s1981_s28, %s1575_s20  ;;  %s1053_s27 = smul.u32 6, %s2017_s13 }
  0x1b   : > { %s2124_s23 = sadd.s32 %s932_s22, %s2015_s12  ;;  %s1174_s11 = smul.u32 7, %s2017_s13 }
  0x1c   : > { %1641 = vmatmul.mubr.msk.f32.vlgmr.msra.gmra.mrb[0].mxu0 %vm330_vm2, %v329_v8  ;;  %s1578_s24 = sshll.u32 %s2124_s23, 1  ;;  %s2145_s29 = sadd.s32 %s1053_s27, %s2015_s12 }
  0x1d   : > { %1734 = vmatpush3.bf16.msra.mxu0 %v1955_v5  ;;  %1662 = vmatprep.mubr.msk.f32.mxu0 %vm1888_vm1, %v1887_v1  ;;  %s935_s25 = scalar_lea.vmem %s1981_s28, %s1578_s24  ;;  %s2166_s14 = sadd.s32 %s1174_s11, %s2015_s12 }
  0x1e   : > { %1735 = vmatprep.subr.bf16.mxu0 %v1886_v0 }
  0x21   : > { %1737 = vmatpush3.bf16.msra.mxu0 %v1958_v7 }
  0x22   : > { %1744 = vmatprep.subr.bf16.mxu0 %v1886_v0 }
  0xef   : > { %v400_v10 = vpop.f32.mrb[0].mxu0 }
  0xf0   : > { %v404_v11 = vadd.f32 %v400_v10, %v328_v9  ;;  %v1642_v12 = vpop.f32.mrb[1].mxu0 }
  0xf2   : > { %1798 = vtanh.f32 %v404_v11  ;;  %v1562_v15 = vmul.f32 -1.442695, %v404_v11 }
  0xf4   : > { %1800 = vpow2.f32 %v1562_v15 }
  0xfc   : > { %v1799_v13 = vpop.eup %1798 }
  0xfd   : > { %419 = vrot.lane.b32.xlu0 %v1799_v13, %s1889_s30 }
  0xfe   : > { %v1801_v16 = vpop.eup %1800 }
  0xff   : > { %v408_v17 = vadd.f32 1.0, %v1801_v16  ;;  %v694_v16 = vld [vmem:[%s693_s8] sm:$0x3] }
 0x101   : > { %414 = vrot.lane.b32.xlu0 %v412_v14, %s1890_s5  ;;  %1802 = vrcp.f32 %v408_v17 }
 0x10b   : > { %v1803_v18 = vpop.eup %1802 }
 0x16f   : > { %v420_v19 = vpop.permute.xlu0 %419 }
 0x170   : > { %v422_v20 = vmul.f32 %v1803_v18, %v420_v19 }
 0x172   : > { %424 = vrot.lane.b32.xlu1 %v422_v20, %s1890_s5 }
 0x173   : > { %v415_v21 = vpop.permute.xlu0 %414 }
 0x174   : > { %v417_v22 = vmul.f32 %v1803_v18, %v415_v21 }
 0x1e4   : > { %v425_v23 = vpop.permute.xlu1 %424 }
 0x1e5   : > { %v427_v24 = vadd.f32 %v425_v23, %v417_v22 }
 0x1e7   : > { %1804 = vtanh.f32 %v427_v24 }
 0x1f1   : > { %v1805_v25 = vpop.eup %1804 }
 0x1f2   : > { %430 = vrot.lane.b32.xlu1 %v1805_v25, %s1889_s30 }
 0x1f6   : > { %441 = vrot.lane.b32.xlu1 %v427_v24, %s1891_s6 }
 0x264   : > { %v431_v26 = vpop.permute.xlu1 %430 }
 0x265   : > { %v433_v27 = vmul.f32 %v1803_v18, %v431_v26 }
 0x267   : > { %435 = vrot.lane.b32.xlu0 %v433_v27, %s1890_s5 }
 0x268   : > { %v442_v28 = vpop.permute.xlu1 %441 }
 0x269   : > { %444 = vst.msk [vmem:[#allocation3] sm:$0x3] %vm318_vm0, %v442_v28 }
 0x270   : > { %v535_v29 = vld [vmem:[#allocation3] sm:$0x3] }
 0x271   : > { %537 = vrot.lane.b32.xlu1 %v535_v29, %s1890_s5 }
 0x2d9   : > { %v436_v30 = vpop.permute.xlu0 %435 }
 0x2da   : > { %439 = vst.msk [vmem:[#allocation2] sm:$0x3] %vm318_vm0, %v436_v30  ;;  %446 = vst.msk [vmem:[%s445_s10] sm:$0x3] %vm318_vm0, %v436_v30  ;;  %s809_s10 = scalar_lea.vmem %s1999_s9, %s1571_s7  ;;  %s1581_s7 = sshll.u32 %s2145_s29, 1 }
 0x2db   : > { %s1056_s8 = scalar_lea.vmem %s1981_s28, %s1581_s7 }
 0x2e1   : > { %v453_v31 = vld [vmem:[#allocation2] sm:$0x3] }
 0x2e2   : > { %1652 = vmatmul.mubr.msk.f32.vlgmr.msra.gmra.mrb[0].mxu1 %vm330_vm2, %v453_v31 }
 0x2e3   : > { %1740 = vmatpush3.bf16.msra.mxu1 %v1955_v5  ;;  %1673 = vmatprep.mubr.msk.f32.mxu1 %vm1888_vm1, %v1887_v1  ;;  %v538_v43 = vpop.permute.xlu1 %537 }
 0x2e4   : > { %1741 = vmatprep.subr.bf16.mxu1 %v1886_v0 }
 0x2e7   : > { %1743 = vmatpush3.bf16.msra.mxu1 %v1958_v7 }
 0x2e8   : > { %1750 = vmatprep.subr.bf16.mxu1 %v1886_v0 }
 0x3b5   : > { %v523_v33 = vpop.f32.mrb[0].mxu1 }
 0x3b6   : > { %v527_v34 = vadd.f32 %v523_v33, %v452_v32  ;;  %v1653_v35 = vpop.f32.mrb[1].mxu1 }
 0x3b8   : > { %1806 = vtanh.f32 %v527_v34  ;;  %v1566_v37 = vmul.f32 -1.442695, %v527_v34 }
 0x3ba   : > { %1808 = vpow2.f32 %v1566_v37 }
 0x3c2   : > { %v1807_v36 = vpop.eup %1806 }
 0x3c3   : > { %542 = vrot.lane.b32.xlu0 %v1807_v36, %s1889_s30 }
 0x3c4   : > { %v1809_v38 = vpop.eup %1808 }
 0x3c5   : > { %v531_v39 = vadd.f32 1.0, %v1809_v38  ;;  %v815_v38 = vld [vmem:[%s814_s21] sm:$0x3] }
 0x3c7   : > { %1810 = vrcp.f32 %v531_v39 }
 0x3d1   : > { %v1811_v40 = vpop.eup %1810 }
 0x3d2   : > { %v540_v44 = vmul.f32 %v1811_v40, %v538_v43 }
 0x435   : > { %v543_v41 = vpop.permute.xlu0 %542 }
 0x436   : > { %v545_v42 = vmul.f32 %v1811_v40, %v543_v41 }
 0x438   : > { %547 = vrot.lane.b32.xlu0 %v545_v42, %s1890_s5 }
 0x4aa   : > { %v548_v45 = vpop.permute.xlu0 %547 }
 0x4ab   : > { %v550_v46 = vadd.f32 %v548_v45, %v540_v44 }
 0x4ad   : > { %1812 = vtanh.f32 %v550_v46 }
 0x4b7   : > { %v1813_v47 = vpop.eup %1812 }
 0x4b8   : > { %553 = vrot.lane.b32.xlu1 %v1813_v47, %s1889_s30 }
 0x4bc   : > { %563 = vrot.lane.b32.xlu1 %v550_v46, %s1891_s6 }
 0x52a   : > { %v554_v48 = vpop.permute.xlu1 %553 }
 0x52b   : > { %v556_v49 = vmul.f32 %v1811_v40, %v554_v48 }
 0x52d   : > { %558 = vrot.lane.b32.xlu0 %v556_v49, %s1890_s5 }
 0x52e   : > { %v564_v50 = vpop.permute.xlu1 %563 }
 0x52f   : > { %566 = vst.msk [vmem:[#allocation3] sm:$0x3] %vm318_vm0, %v564_v50 }
 0x536   : > { %v656_v51 = vld [vmem:[#allocation3] sm:$0x3] }
 0x537   : > { %658 = vrot.lane.b32.xlu1 %v656_v51, %s1890_s5 }
 0x59f   : > { %v559_v52 = vpop.permute.xlu0 %558 }
 0x5a0   : > { %561 = vst.msk [vmem:[#allocation2] sm:$0x3] %vm318_vm0, %v559_v52  ;;  %568 = vst.msk [vmem:[%s567_s15] sm:$0x3] %vm318_vm0, %v559_v52  ;;  %s930_s15 = scalar_lea.vmem %s1999_s9, %s1575_s20  ;;  %s1584_s20 = sshll.u32 %s2166_s14, 1 }
 0x5a1   : > { %s1177_s21 = scalar_lea.vmem %s1981_s28, %s1584_s20  ;;  %s1558_s28 = sshll.u32 %s1946_s19, 1 }
 0x5a2   : > { %s1293_s22 = scalar_lea.vmem %s1999_s9, %s1584_s20 }
 0x5a7   : > { %v574_v53 = vld [vmem:[#allocation2] sm:$0x3] }
 0x5a8   : > { %1663 = vmatmul.mubr.msk.f32.vlgmr.msra.gmra.mrb[2].mxu0 %vm330_vm2, %v574_v53 }
 0x5a9   : > { %1746 = vmatpush3.bf16.msra.mxu0 %v1955_v5  ;;  %1684 = vmatprep.mubr.msk.f32.mxu0 %vm1888_vm1, %v1887_v1  ;;  %v659_v3 = vpop.permute.xlu1 %658 }
 0x5aa   : > { %1747 = vmatprep.subr.bf16.mxu0 %v1886_v0 }
 0x5ad   : > { %1749 = vmatpush3.bf16.msra.mxu0 %v1958_v7 }
 0x5ae   : > { %1756 = vmatprep.subr.bf16.mxu0 %v1886_v0 }
 0x67b   : > { %v644_v55 = vpop.f32.mrb[2].mxu0 }
 0x67c   : > { %v648_v56 = vadd.f32 %v644_v55, %v573_v54  ;;  %v1664_v57 = vpop.f32.mrb[3].mxu0 }
 0x67e   : > { %1814 = vtanh.f32 %v648_v56  ;;  %v1570_v59 = vmul.f32 -1.442695, %v648_v56 }
 0x680   : > { %1816 = vpow2.f32 %v1570_v59 }
 0x688   : > { %v1815_v58 = vpop.eup %1814 }
 0x689   : > { %663 = vrot.lane.b32.xlu0 %v1815_v58, %s1889_s30 }
 0x68a   : > { %v1817_v60 = vpop.eup %1816 }
 0x68b   : > { %v652_v61 = vadd.f32 1.0, %v1817_v60  ;;  %v936_v60 = vld [vmem:[%s935_s25] sm:$0x3] }
 0x68d   : > { %1818 = vrcp.f32 %v652_v61 }
 0x697   : > { %v1819_v62 = vpop.eup %1818 }
 0x698   : > { %v661_v4 = vmul.f32 %v1819_v62, %v659_v3 }
 0x6fb   : > { %v664_v63 = vpop.permute.xlu0 %663 }
 0x6fc   : > { %v666_v2 = vmul.f32 %v1819_v62, %v664_v63 }
 0x6fe   : > { %668 = vrot.lane.b32.xlu0 %v666_v2, %s1890_s5 }
 0x770   : > { %v669_v6 = vpop.permute.xlu0 %668 }
 0x771   : > { %v671_v8 = vadd.f32 %v669_v6, %v661_v4 }
 0x773   : > { %1820 = vtanh.f32 %v671_v8 }
 0x77d   : > { %v1821_v9 = vpop.eup %1820 }
 0x77e   : > { %674 = vrot.lane.b32.xlu1 %v1821_v9, %s1889_s30 }
 0x782   : > { %684 = vrot.lane.b32.xlu1 %v671_v8, %s1891_s6 }
 0x7f0   : > { %v675_v10 = vpop.permute.xlu1 %674 }
 0x7f1   : > { %v677_v11 = vmul.f32 %v1819_v62, %v675_v10 }
 0x7f3   : > { %679 = vrot.lane.b32.xlu0 %v677_v11, %s1890_s5 }
 0x7f4   : > { %v685_v12 = vpop.permute.xlu1 %684 }
 0x7f5   : > { %687 = vst.msk [vmem:[#allocation3] sm:$0x3] %vm318_vm0, %v685_v12 }
 0x7fc   : > { %v777_v13 = vld [vmem:[#allocation3] sm:$0x3] }
 0x7fd   : > { %779 = vrot.lane.b32.xlu1 %v777_v13, %s1890_s5 }
 0x865   : > { %v680_v14 = vpop.permute.xlu0 %679 }
 0x866   : > { %682 = vst.msk [vmem:[#allocation2] sm:$0x3] %vm318_vm0, %v680_v14  ;;  %689 = vst.msk [vmem:[%s688_s26] sm:$0x3] %vm318_vm0, %v680_v14  ;;  %s1051_s26 = scalar_lea.vmem %s1999_s9, %s1578_s24 }
 0x86d   : > { %v695_v15 = vld [vmem:[#allocation2] sm:$0x3] }
 0x86e   : > { %1674 = vmatmul.mubr.msk.f32.vlgmr.msra.gmra.mrb[2].mxu1 %vm330_vm2, %v695_v15 }
 0x86f   : > { %1752 = vmatpush3.bf16.msra.mxu1 %v1955_v5  ;;  %1695 = vmatprep.mubr.msk.f32.mxu1 %vm1888_vm1, %v1887_v1  ;;  %v780_v27 = vpop.permute.xlu1 %779 }
 0x870   : > { %1753 = vmatprep.subr.bf16.mxu1 %v1886_v0 }
 0x873   : > { %1755 = vmatpush3.bf16.msra.mxu1 %v1958_v7 }
 0x874   : > { %1762 = vmatprep.subr.bf16.mxu1 %v1886_v0 }
 0x941   : > { %v765_v17 = vpop.f32.mrb[2].mxu1 }
 0x942   : > { %v769_v18 = vadd.f32 %v765_v17, %v694_v16  ;;  %v1675_v19 = vpop.f32.mrb[3].mxu1 }
 0x944   : > { %1822 = vtanh.f32 %v769_v18  ;;  %v1573_v21 = vmul.f32 -1.442695, %v769_v18  ;;  %v1057_v18 = vld [vmem:[%s1056_s8] sm:$0x3] }
 0x946   : > { %1824 = vpow2.f32 %v1573_v21 }
 0x94e   : > { %v1823_v20 = vpop.eup %1822 }
 0x94f   : > { %784 = vrot.lane.b32.xlu0 %v1823_v20, %s1889_s30 }
 0x950   : > { %v1825_v22 = vpop.eup %1824 }
 0x951   : > { %v773_v23 = vadd.f32 1.0, %v1825_v22 }
 0x953   : > { %1826 = vrcp.f32 %v773_v23 }
 0x95d   : > { %v1827_v24 = vpop.eup %1826 }
 0x95e   : > { %v782_v28 = vmul.f32 %v1827_v24, %v780_v27 }
 0x9c1   : > { %v785_v25 = vpop.permute.xlu0 %784 }
 0x9c2   : > { %v787_v26 = vmul.f32 %v1827_v24, %v785_v25 }
 0x9c4   : > { %789 = vrot.lane.b32.xlu0 %v787_v26, %s1890_s5 }
 0xa36   : > { %v790_v29 = vpop.permute.xlu0 %789 }
 0xa37   : > { %v792_v30 = vadd.f32 %v790_v29, %v782_v28 }
 0xa39   : > { %1828 = vtanh.f32 %v792_v30 }
 0xa43   : > { %v1829_v31 = vpop.eup %1828 }
 0xa44   : > { %795 = vrot.lane.b32.xlu1 %v1829_v31, %s1889_s30 }
 0xa48   : > { %805 = vrot.lane.b32.xlu1 %v792_v30, %s1891_s6 }
 0xab6   : > { %v796_v32 = vpop.permute.xlu1 %795 }
 0xab7   : > { %v798_v33 = vmul.f32 %v1827_v24, %v796_v32 }
 0xab9   : > { %800 = vrot.lane.b32.xlu0 %v798_v33, %s1890_s5 }
 0xaba   : > { %v806_v34 = vpop.permute.xlu1 %805 }
 0xabb   : > { %808 = vst.msk [vmem:[#allocation3] sm:$0x3] %vm318_vm0, %v806_v34 }
 0xac2   : > { %v898_v35 = vld [vmem:[#allocation3] sm:$0x3] }
 0xac3   : > { %900 = vrot.lane.b32.xlu1 %v898_v35, %s1890_s5 }
 0xb2b   : > { %v801_v36 = vpop.permute.xlu0 %800 }
 0xb2c   : > { %803 = vst.msk [vmem:[#allocation2] sm:$0x3] %vm318_vm0, %v801_v36  ;;  %810 = vst.msk [vmem:[%s809_s10] sm:$0x3] %vm318_vm0, %v801_v36  ;;  %s1172_s10 = scalar_lea.vmem %s1999_s9, %s1581_s7 }
 0xb33   : > { %v816_v37 = vld [vmem:[#allocation2] sm:$0x3] }
 0xb34   : > { %1685 = vmatmul.mubr.msk.f32.vlgmr.msra.gmra.mrb[4].mxu0 %vm330_vm2, %v816_v37 }
 0xb35   : > { %1758 = vmatpush3.bf16.msra.mxu0 %v1955_v5  ;;  %1706 = vmatprep.mubr.msk.f32.mxu0 %vm1888_vm1, %v1887_v1  ;;  %v901_v49 = vpop.permute.xlu1 %900 }
 0xb36   : > { %1759 = vmatprep.subr.bf16.mxu0 %v1886_v0 }
 0xb39   : > { %1761 = vmatpush3.bf16.msra.mxu0 %v1958_v7 }
 0xc07   : > { %v886_v39 = vpop.f32.mrb[4].mxu0 }
 0xc08   : > { %v890_v40 = vadd.f32 %v886_v39, %v815_v38  ;;  %v1686_v41 = vpop.f32.mrb[5].mxu0 }
 0xc0a   : > { %1830 = vtanh.f32 %v890_v40  ;;  %v1577_v43 = vmul.f32 -1.442695, %v890_v40  ;;  %v1178_v40 = vld [vmem:[%s1177_s21] sm:$0x3] }
 0xc0c   : > { %1832 = vpow2.f32 %v1577_v43 }
 0xc14   : > { %v1831_v42 = vpop.eup %1830 }
 0xc15   : > { %905 = vrot.lane.b32.xlu0 %v1831_v42, %s1889_s30 }
 0xc16   : > { %v1833_v44 = vpop.eup %1832 }
 0xc17   : > { %v894_v45 = vadd.f32 1.0, %v1833_v44 }
 0xc19   : > { %1834 = vrcp.f32 %v894_v45 }
 0xc23   : > { %v1835_v46 = vpop.eup %1834 }
 0xc24   : > { %v903_v50 = vmul.f32 %v1835_v46, %v901_v49 }
 0xc87   : > { %v906_v47 = vpop.permute.xlu0 %905 }
 0xc88   : > { %v908_v48 = vmul.f32 %v1835_v46, %v906_v47 }
 0xc8a   : > { %910 = vrot.lane.b32.xlu0 %v908_v48, %s1890_s5 }
 0xcfc   : > { %v911_v51 = vpop.permute.xlu0 %910 }
 0xcfd   : > { %v913_v52 = vadd.f32 %v911_v51, %v903_v50 }
 0xcff   : > { %1836 = vtanh.f32 %v913_v52 }
 0xd09   : > { %v1837_v53 = vpop.eup %1836 }
 0xd0a   : > { %916 = vrot.lane.b32.xlu1 %v1837_v53, %s1889_s30 }
 0xd0e   : > { %926 = vrot.lane.b32.xlu1 %v913_v52, %s1891_s6 }
 0xd7c   : > { %v917_v54 = vpop.permute.xlu1 %916 }
 0xd7d   : > { %v919_v55 = vmul.f32 %v1835_v46, %v917_v54 }
 0xd7f   : > { %921 = vrot.lane.b32.xlu0 %v919_v55, %s1890_s5 }
 0xd80   : > { %v927_v56 = vpop.permute.xlu1 %926 }
 0xd81   : > { %929 = vst.msk [vmem:[#allocation3] sm:$0x3] %vm318_vm0, %v927_v56 }
 0xd88   : > { %v1019_v57 = vld [vmem:[#allocation3] sm:$0x3] }
 0xd89   : > { %1021 = vrot.lane.b32.xlu1 %v1019_v57, %s1890_s5 }
 0xdf1   : > { %v922_v58 = vpop.permute.xlu0 %921 }
 0xdf2   : > { %924 = vst.msk [vmem:[#allocation2] sm:$0x3] %vm318_vm0, %v922_v58  ;;  %931 = vst.msk [vmem:[%s930_s15] sm:$0x3] %vm318_vm0, %v922_v58  ;;  %s313_s15 = scalar_lea.vmem %s2205_s4, %s1558_s28 }
 0xdf9   : > { %v937_v59 = vld [vmem:[#allocation2] sm:$0x3] }
 0xdfa   : > { %1696 = vmatmul.mubr.msk.f32.vlgmr.msra.gmra.mrb[4].mxu1 %vm330_vm2, %v937_v59 }
 0xdfb   : > { %1764 = vmatpush3.bf16.msra.mxu1 %v1955_v5  ;;  %1717 = vmatprep.mubr.msk.f32.mxu1 %vm1888_vm1, %v1887_v1  ;;  %v1022_v6 = vpop.permute.xlu1 %1021 }
 0xdfc   : > { %1765 = vmatprep.subr.bf16.mxu1 %v1886_v0 }
 0xdff   : > { %1767 = vmatpush3.bf16.msra.mxu1 %v1958_v7 }
 0xecd   : > { %v1007_v61 = vpop.f32.mrb[4].mxu1 }
 0xece   : > { %v1011_v62 = vadd.f32 %v1007_v61, %v936_v60  ;;  %v1697_v63 = vpop.f32.mrb[5].mxu1 }
 0xed0   : > { %1838 = vtanh.f32 %v1011_v62  ;;  %v1580_v1 = vmul.f32 -1.442695, %v1011_v62 }
 0xed2   : > { %1840 = vpow2.f32 %v1580_v1 }
 0xeda   : > { %v1839_v5 = vpop.eup %1838 }
 0xedb   : > { %1026 = vrot.lane.b32.xlu0 %v1839_v5, %s1889_s30 }
 0xedc   : > { %v1841_v0 = vpop.eup %1840 }
 0xedd   : > { %v1015_v7 = vadd.f32 1.0, %v1841_v0 }
 0xedf   : > { %1842 = vrcp.f32 %v1015_v7 }
 0xee9   : > { %v1843_v2 = vpop.eup %1842 }
 0xeea   : > { %v1024_v8 = vmul.f32 %v1843_v2, %v1022_v6 }
 0xf4d   : > { %v1027_v3 = vpop.permute.xlu0 %1026 }
 0xf4e   : > { %v1029_v4 = vmul.f32 %v1843_v2, %v1027_v3 }
 0xf50   : > { %1031 = vrot.lane.b32.xlu0 %v1029_v4, %s1890_s5 }
 0xfc2   : > { %v1032_v9 = vpop.permute.xlu0 %1031 }
 0xfc3   : > { %v1034_v10 = vadd.f32 %v1032_v9, %v1024_v8 }
 0xfc5   : > { %1844 = vtanh.f32 %v1034_v10 }
 0xfcf   : > { %v1845_v11 = vpop.eup %1844 }
 0xfd0   : > { %1037 = vrot.lane.b32.xlu1 %v1845_v11, %s1889_s30 }
 0xfd4   : > { %1047 = vrot.lane.b32.xlu1 %v1034_v10, %s1891_s6 }
0x1042   : > { %v1038_v12 = vpop.permute.xlu1 %1037 }
0x1043   : > { %v1040_v13 = vmul.f32 %v1843_v2, %v1038_v12 }
0x1045   : > { %1042 = vrot.lane.b32.xlu0 %v1040_v13, %s1890_s5 }
0x1046   : > { %v1048_v14 = vpop.permute.xlu1 %1047 }
0x1047   : > { %1050 = vst.msk [vmem:[#allocation3] sm:$0x3] %vm318_vm0, %v1048_v14 }
0x104e   : > { %v1140_v15 = vld [vmem:[#allocation3] sm:$0x3] }
0x104f   : > { %1142 = vrot.lane.b32.xlu1 %v1140_v15, %s1890_s5 }
0x10b7   : > { %v1043_v16 = vpop.permute.xlu0 %1042 }
0x10b8   : > { %1045 = vst.msk [vmem:[#allocation2] sm:$0x3] %vm318_vm0, %v1043_v16  ;;  %1052 = vst.msk [vmem:[%s1051_s26] sm:$0x3] %vm318_vm0, %v1043_v16 }
0x10bf   : > { %v1058_v17 = vld [vmem:[#allocation2] sm:$0x3] }
0x10c0   : > { %1707 = vmatmul.mubr.msk.f32.vlgmr.msra.gmra.mrb[6].mxu0 %vm330_vm2, %v1058_v17 }
0x10c1   : > { %v1143_v29 = vpop.permute.xlu1 %1142 }
0x1193   : > { %v1128_v19 = vpop.f32.mrb[6].mxu0 }
0x1194   : > { %v1132_v20 = vadd.f32 %v1128_v19, %v1057_v18  ;;  %v1708_v21 = vpop.f32.mrb[7].mxu0 }
0x1196   : > { %1846 = vtanh.f32 %v1132_v20  ;;  %v1583_v23 = vmul.f32 -1.442695, %v1132_v20 }
0x1198   : > { %1848 = vpow2.f32 %v1583_v23 }
0x11a0   : > { %v1847_v22 = vpop.eup %1846 }
0x11a1   : > { %1147 = vrot.lane.b32.xlu0 %v1847_v22, %s1889_s30 }
0x11a2   : > { %v1849_v24 = vpop.eup %1848 }
0x11a3   : > { %v1136_v25 = vadd.f32 1.0, %v1849_v24 }
0x11a5   : > { %1850 = vrcp.f32 %v1136_v25 }
0x11af   : > { %v1851_v26 = vpop.eup %1850 }
0x11b0   : > { %v1145_v30 = vmul.f32 %v1851_v26, %v1143_v29 }
0x1213   : > { %v1148_v27 = vpop.permute.xlu0 %1147 }
0x1214   : > { %v1150_v28 = vmul.f32 %v1851_v26, %v1148_v27 }
0x1216   : > { %1152 = vrot.lane.b32.xlu0 %v1150_v28, %s1890_s5 }
0x1288   : > { %v1153_v31 = vpop.permute.xlu0 %1152 }
0x1289   : > { %v1155_v32 = vadd.f32 %v1153_v31, %v1145_v30 }
0x128b   : > { %1852 = vtanh.f32 %v1155_v32 }
0x1295   : > { %v1853_v33 = vpop.eup %1852 }
0x1296   : > { %1158 = vrot.lane.b32.xlu1 %v1853_v33, %s1889_s30 }
0x129a   : > { %1168 = vrot.lane.b32.xlu1 %v1155_v32, %s1891_s6 }
0x1308   : > { %v1159_v34 = vpop.permute.xlu1 %1158 }
0x1309   : > { %v1161_v35 = vmul.f32 %v1851_v26, %v1159_v34 }
0x130b   : > { %1163 = vrot.lane.b32.xlu0 %v1161_v35, %s1890_s5 }
0x130c   : > { %v1169_v36 = vpop.permute.xlu1 %1168 }
0x130d   : > { %1171 = vst.msk [vmem:[#allocation3] sm:$0x3] %vm318_vm0, %v1169_v36 }
0x1314   : > { %v1261_v37 = vld [vmem:[#allocation3] sm:$0x3] }
0x1315   : > { %1263 = vrot.lane.b32.xlu1 %v1261_v37, %s1890_s5 }
0x137d   : > { %v1164_v38 = vpop.permute.xlu0 %1163 }
0x137e   : > { %1166 = vst.msk [vmem:[#allocation2] sm:$0x3] %vm318_vm0, %v1164_v38  ;;  %1173 = vst.msk [vmem:[%s1172_s10] sm:$0x3] %vm318_vm0, %v1164_v38 }
0x1385   : > { %v1179_v39 = vld [vmem:[#allocation2] sm:$0x3] }
0x1386   : > { %1718 = vmatmul.mubr.msk.f32.vlgmr.msra.gmra.mrb[6].mxu1 %vm330_vm2, %v1179_v39 }
0x1387   : > { %v1264_v51 = vpop.permute.xlu1 %1263 }
0x1459   : > { %v1249_v41 = vpop.f32.mrb[6].mxu1 }
0x145a   : > { %v1253_v42 = vadd.f32 %v1249_v41, %v1178_v40  ;;  %v1719_v43 = vpop.f32.mrb[7].mxu1 }
0x145c   : > { %1854 = vtanh.f32 %v1253_v42  ;;  %v1586_v45 = vmul.f32 -1.442695, %v1253_v42 }
0x145e   : > { %1856 = vpow2.f32 %v1586_v45 }
0x1466   : > { %v1855_v44 = vpop.eup %1854 }
0x1467   : > { %1268 = vrot.lane.b32.xlu0 %v1855_v44, %s1889_s30 }
0x1468   : > { %v1857_v46 = vpop.eup %1856 }
0x1469   : > { %v1257_v47 = vadd.f32 1.0, %v1857_v46 }
0x146b   : > { %1858 = vrcp.f32 %v1257_v47 }
0x1475   : > { %v1859_v48 = vpop.eup %1858 }
0x1476   : > { %v1266_v52 = vmul.f32 %v1859_v48, %v1264_v51 }
0x14d9   : > { %v1269_v49 = vpop.permute.xlu0 %1268 }
0x14da   : > { %v1271_v50 = vmul.f32 %v1859_v48, %v1269_v49 }
0x14dc   : > { %1273 = vrot.lane.b32.xlu0 %v1271_v50, %s1890_s5 }
0x154e   : > { %v1274_v53 = vpop.permute.xlu0 %1273 }
0x154f   : > { %v1276_v54 = vadd.f32 %v1274_v53, %v1266_v52 }
0x1551   : > { %1860 = vtanh.f32 %v1276_v54 }
0x155b   : > { %v1861_v55 = vpop.eup %1860 }
0x155c   : > { %1279 = vrot.lane.b32.xlu1 %v1861_v55, %s1889_s30 }
0x1560   : > { %1289 = vrot.lane.b32.xlu1 %v1276_v54, %s1891_s6  ;;  %s309_s6 = scalar_lea.vmem %s2204_s3, %s1558_s28 }
0x15ce   : > { %v1280_v56 = vpop.permute.xlu1 %1279 }
0x15cf   : > { %v1282_v57 = vmul.f32 %v1859_v48, %v1280_v56 }
0x15d1   : > { %1284 = vrot.lane.b32.xlu0 %v1282_v57, %s1890_s5 }
0x15d2   : > { %v1290_v58 = vpop.permute.xlu1 %1289 }
0x15d3   : > { %1292 = vst.msk [vmem:[#allocation3] sm:$0x3] %vm318_vm0, %v1290_v58 }
0x15da   : > { %v1297_v59 = vld [vmem:[#allocation3] sm:$0x3] }
0x15db   : > { %1298 = vst.msk [vmem:[%s313_s15] sm:$0x3] %vm318_vm0, %v1297_v59 }
0x1643   : > { %v1285_v60 = vpop.permute.xlu0 %1284 }
0x1644   : > { %1287 = vst.msk [vmem:[#allocation2] sm:$0x3] %vm318_vm0, %v1285_v60  ;;  %1294 = vst.msk [vmem:[%s1293_s22] sm:$0x3] %vm318_vm0, %v1285_v60 }
0x164b   : > { %v1295_v61 = vld [vmem:[#allocation2] sm:$0x3] }
0x164c   : > { %1296 = vst.msk [vmem:[%s309_s6] sm:$0x3] %vm318_vm0, %v1295_v61 }
0x164d PF: > { %s15_s17 = sadd.s32 1, %s1884_s17   ;;  %s2206_s15 = smov %s1880_s16 }
0x164e   : > { %p12_p5 = scmp.ge.s32.totalorder %s15_s17, 4   ;;  %s2207_s16 = smov %s2209_s18 }
0x1650   :  { %14 = sbr.rel (!%p12_p5) target bundleno = 2 (0x2), region = 105 }

</bundles_post_ra>
